<compile_context>
chip_gen: v5e
topology: v5e:2x2
jax: 0.10.0
libtpu: 0.0.40
codegen_flags: <defaults>
</compile_context>

<pallas_src>
import jax
import jax.numpy as jnp
from jax import lax
from jax.experimental import pallas as pl
from jax.experimental.pallas import tpu as pltpu

_INV_SQRT2 = 0.7071067811865476
_BN_EPS = 1e-5
_LANE = 128


def _gelu_exact(x):
    return 0.5 * x * (1.0 + lax.erf(x * _INV_SQRT2))


def _hw_budgets():
    """(vmem_limit_bytes, tile_byte_budget, tile_rows_cap), generation aware."""
    phys = 0
    try:
        phys = int(pltpu.get_tpu_info().vmem_capacity_bytes)
    except Exception:
        phys = 0
    if phys and phys <= 64 * 1024 * 1024:            # v7x-class: 64 MiB / TC
        return 32 * 1024 * 1024, 8 * 1024 * 1024, 1024
    return 64 * 1024 * 1024, 16 * 1024 * 1024, 2048  # v5e / v6e: 128 MiB phys


# ----------------------------- Pallas kernels ------------------------------ #
# m_ref holds 4 edge-validity masks, shape (4, 1, TILE):
#   0: h-1 in range, 1: h+1 in range, 2: w-1 in range, 3: w+1 in range.

def _conv3x3_taps(x, w_ref, m_ref, img_w, tile):
    """3x3 'same' conv on a (C, TILE) slab of whole images: sum of 9 per-tap
    (C, C) x (C, TILE) matmuls; taps are lane rotations + edge masks."""
    mh = {-1: 0, 1: 1}
    mw = {-1: 2, 1: 3}
    acc = None
    for t in range(9):
        dy, dx = t // 3 - 1, t % 3 - 1
        d = dy * img_w + dx
        tap = x if d == 0 else pltpu.roll(x, shift=(-d) % tile, axis=1)
        if dy != 0 and dx != 0:
            tap = tap * (m_ref[mh[dy]] * m_ref[mw[dx]])
        elif dy != 0:
            tap = tap * m_ref[mh[dy]]
        elif dx != 0:
            tap = tap * m_ref[mw[dx]]
        part = jnp.dot(w_ref[t], tap, preferred_element_type=jnp.float32)
        acc = part if acc is None else acc + part
    return acc


def _make_feb1_kernel(img_w, tile):
    inv_t = 1.0 / tile

    def kernel(x_ref, w_ref, b_ref, m_ref, y_ref, stat_ref):
        # conv1 + bias; emit per-tile centered BatchNorm partials (mean, M2).
        y = _conv3x3_taps(x_ref[...], w_ref, m_ref, img_w, tile) + b_ref[...]
        y_ref[...] = y
        mean = jnp.sum(y, axis=1, keepdims=True) * inv_t            # (C, 1)
        yc = y - mean
        m2 = jnp.sum(yc * yc, axis=1, keepdims=True)                # (C, 1)
        stat_ref[...] = jnp.concatenate([mean, m2], axis=1)[None]   # (1, C, 2)

    return kernel


def _make_feb2_kernel(img_w, tile):
    def kernel(y_ref, x_ref, w_ref, b_ref, sc_ref, sh_ref, m_ref, o_ref):
        # fused BatchNorm affine + exact-erf GELU + conv2 + bias + residual.
        g = _gelu_exact(y_ref[...] * sc_ref[...] + sh_ref[...])
        o_ref[...] = (_conv3x3_taps(g, w_ref, m_ref, img_w, tile)
                      + b_ref[...] + x_ref[...])

    return kernel


def down_proj_kernel(p_ref, wd_ref, bd_ref, wp_ref, bp_ref, o_ref):
    # strided downsample conv (as matmul) + bias + GELU, then 1x1 projection.
    z = jnp.dot(wd_ref[...], p_ref[...], preferred_element_type=jnp.float32)
    z = _gelu_exact(z + bd_ref[...])
    o_ref[...] = (jnp.dot(wp_ref[...], z, preferred_element_type=jnp.float32)
                  + bp_ref[...])


# --------------------------- tiling / spec helpers -------------------------- #

def _const_spec(shape):
    nd = len(shape)
    return pl.BlockSpec(shape, lambda i: (0,) * nd)


def _images_per_tile(n_imgs, hw, bytes_per_col, budget, rows_cap):
    """Images per grid step.  Tiles always cover whole images so the in-kernel
    lane rolls never need a halo; only falls back to one full-extent block when
    H*W is not lane-aligned (tiny shapes only)."""
    if hw % _LANE != 0:
        return n_imgs
    target_rows = min(rows_cap, max(hw, budget // max(1, 2 * bytes_per_col)))
    m = max(1, min(n_imgs, target_rows // hw))
    if n_imgs >= 2:                       # keep >= 2 grid steps: pipelining and
        m = max(1, min(m, n_imgs // 2))   # megacore sharding on v7x
    while n_imgs % m:
        m -= 1
    return m


def _edge_masks(h, w, m_imgs):
    hw = h * w
    hh = jnp.arange(hw, dtype=jnp.int32) // w
    ww = jnp.arange(hw, dtype=jnp.int32) % w
    base = jnp.stack([
        (hh >= 1).astype(jnp.float32),        # h-1 valid
        (hh <= h - 2).astype(jnp.float32),    # h+1 valid
        (ww >= 1).astype(jnp.float32),        # w-1 valid
        (ww <= w - 2).astype(jnp.float32),    # w+1 valid
    ])                                        # (4, hw)
    return jnp.tile(base, (1, m_imgs))[:, None, :]   # (4, 1, m_imgs*hw)


def _conv3x3_w_taps(w):
    # (Co, Ci, 3, 3) -> (9, Co, Ci), tap index t = ky*3 + kx, offset = (ky-1, kx-1)
    co, ci, kh, kw = w.shape
    return jnp.transpose(w, (2, 3, 0, 1)).reshape(kh * kw, co, ci)


def _conv_w_to_mat_t(w):
    # (Co, Ci, kh, kw) -> (Co, kh*kw*Ci); column = (kh_i*kw + kw_i)*Ci + ci
    co, ci, kh, kw = w.shape
    return jnp.transpose(w, (0, 2, 3, 1)).reshape(co, kh * kw * ci)


def _space_to_depth_t(x_cnhw, s):
    # (C, N, H, W) -> (s*s*C, N*(H/s)*(W/s)), row index = (dy*s+dx)*C + c
    c, n, h, w = x_cnhw.shape
    x = x_cnhw.reshape(c, n, h // s, s, w // s, s)
    x = jnp.transpose(x, (3, 5, 0, 1, 2, 4))
    return x.reshape(s * s * c, n * (h // s) * (w // s))


# ------------------------------- forward pass ------------------------------- #

def init_params(key, in_ch, num_convs):
    s = 2 ** num_convs
    ks = jax.random.split(key, 10)
    p = {
        "w1": 0.1 * jax.random.normal(ks[0], (in_ch, in_ch, 3, 3), jnp.float32),
        "b1": 0.1 * jax.random.normal(ks[1], (in_ch,), jnp.float32),
        "gamma": 1.0 + 0.1 * jax.random.normal(ks[2], (in_ch,), jnp.float32),
        "beta": 0.1 * jax.random.normal(ks[3], (in_ch,), jnp.float32),
        "w2": 0.1 * jax.random.normal(ks[4], (in_ch, in_ch, 3, 3), jnp.float32),
        "b2": 0.1 * jax.random.normal(ks[5], (in_ch,), jnp.float32),
        "wd": 0.1 * jax.random.normal(ks[6], (in_ch, in_ch, s, s), jnp.float32),
        "bd": 0.1 * jax.random.normal(ks[7], (in_ch,), jnp.float32),
        "wp": 0.1 * jax.random.normal(ks[8], (in_ch, in_ch, 1, 1), jnp.float32),
        "bp": 0.1 * jax.random.normal(ks[9], (in_ch,), jnp.float32),
    }
    return p, s


def encoder_forward(x_nchw, params, scale):
    n, c, h, w = x_nchw.shape
    hw = h * w
    rows = n * hw
    vmem_limit, tile_budget, rows_cap = _hw_budgets()

    def _cparams(sem):
        return pltpu.CompilerParams(dimension_semantics=sem,
                                    vmem_limit_bytes=vmem_limit)

    x_t = jnp.transpose(x_nchw, (1, 0, 2, 3)).reshape(c, rows)      # (C, rows)

    w1t = _conv3x3_w_taps(params["w1"])                             # (9, C, C)
    w2t = _conv3x3_w_taps(params["w2"])                             # (9, C, C)
    wdt = _conv_w_to_mat_t(params["wd"])                            # (C, s*s*C)
    wpt = params["wp"].reshape(c, c)

    m_imgs = _images_per_tile(n, hw, 3 * c * 4, tile_budget, rows_cap)
    tile = m_imgs * hw
    grid = (n // m_imgs,)
    masks = _edge_masks(h, w, m_imgs)                               # (4, 1, tile)
    act_spec = pl.BlockSpec((c, tile), lambda i: (0, i))

    # --- ResConv conv1 + bias (+ per-tile BN partial stats) ---
    cost1 = pl.CostEstimate(
        flops=2 * rows * 9 * c * c + 4 * rows * c, transcendentals=0,
        bytes_accessed=4 * (2 * rows * c + 9 * c * c + 4 * tile + c
                            + 2 * c * grid[0]))
    y_t, stats = pl.pallas_call(
        _make_feb1_kernel(w, tile),
        grid=grid,
        in_specs=[act_spec, _const_spec((9, c, c)), _const_spec((c, 1)),
                  _const_spec((4, 1, tile))],
        out_specs=(act_spec, pl.BlockSpec((1, c, 2), lambda i: (i, 0, 0))),
        out_shape=(jax.ShapeDtypeStruct((c, rows), jnp.float32),
                   jax.ShapeDtypeStruct((grid[0], c, 2), jnp.float32)),
        compiler_params=_cparams(("parallel",)),
        cost_estimate=cost1,
    )(x_t, w1t, params["b1"].reshape(c, 1), masks)

    # finalize training-mode BatchNorm stats (Chan combine, tiny (C,) math)
    mean_i = stats[:, :, 0]                                         # (G, C)
    m2_i = stats[:, :, 1]                                           # (G, C)
    mean = jnp.mean(mean_i, axis=0)                                 # (C,)
    var = (jnp.sum(m2_i, axis=0)
           + tile * jnp.sum(jnp.square(mean_i - mean[None, :]), axis=0)) / rows
    var = jnp.maximum(var, 0.0)
    inv = lax.rsqrt(var + _BN_EPS)
    bn_scale = (params["gamma"] * inv).reshape(c, 1)
    bn_shift = (params["beta"] - mean * params["gamma"] * inv).reshape(c, 1)

    # --- fused BN affine + exact GELU + conv2 + bias + residual ---
    cost2 = pl.CostEstimate(
        flops=2 * rows * 9 * c * c + 10 * rows * c,
        transcendentals=rows * c,
        bytes_accessed=4 * (3 * rows * c + 9 * c * c + 4 * tile + 3 * c))
    feb_t = pl.pallas_call(
        _make_feb2_kernel(w, tile),
        grid=grid,
        in_specs=[act_spec, act_spec, _const_spec((9, c, c)),
                  _const_spec((c, 1)), _const_spec((c, 1)),
                  _const_spec((c, 1)), _const_spec((4, 1, tile))],
        out_specs=act_spec,
        out_shape=jax.ShapeDtypeStruct((c, rows), jnp.float32),
        compiler_params=_cparams(("parallel",)),
        cost_estimate=cost2,
    )(y_t, x_t, w2t, params["b2"].reshape(c, 1), bn_scale, bn_shift, masks)

    # --- DownSample (kernel = stride = scale) + GELU, then 1x1 projection ---
    hs, ws = h // scale, w // scale
    rows_d = n * hs * ws
    kd = scale * scale * c
    pd = _space_to_depth_t(feb_t.reshape(c, n, h, w), scale)        # (s*s*C, rows_d)

    if rows_d % _LANE == 0 and rows_d >= 2 * _LANE:
        tile_d = max(_LANE, min(512, rows_d // 2))
        tile_d -= tile_d % _LANE
        while rows_d % tile_d:
            tile_d -= _LANE
        grid_d = (rows_d // tile_d,)
        pd_spec = pl.BlockSpec((kd, tile_d), lambda i: (0, i))
        od_spec = pl.BlockSpec((c, tile_d), lambda i: (0, i))
    else:
        # tiny downsampled tail (demo shapes, rows_d < 256): single block.
        grid_d = (1,)
        pd_spec = pl.BlockSpec((kd, rows_d), lambda i: (0, 0))
        od_spec = pl.BlockSpec((c, rows_d), lambda i: (0, 0))

    cost_d = pl.CostEstimate(
        flops=2 * rows_d * c * (kd + c), transcendentals=rows_d * c,
        bytes_accessed=4 * (rows_d * (kd + c) + c * kd + c * c + 2 * c))
    out_t = pl.pallas_call(
        down_proj_kernel,
        grid=grid_d,
        in_specs=[pd_spec, _const_spec((c, kd)), _const_spec((c, 1)),
                  _const_spec((c, c)), _const_spec((c, 1))],
        out_specs=od_spec,
        out_shape=jax.ShapeDtypeStruct((c, rows_d), jnp.float32),
        compiler_params=_cparams(("parallel",)),
        cost_estimate=cost_d,
    )(pd, wdt, params["bd"].reshape(c, 1), wpt, params["bp"].reshape(c, 1))

    return jnp.transpose(out_t.reshape(c, n, hs, ws), (1, 0, 2, 3))  # NCHW


# --------------------------- pure-JAX reference ----------------------------- #

def encoder_reference(x, p, scale):
    dn = ("NCHW", "OIHW", "NCHW")

    def conv(x, w, b, stride, pad):
        y = lax.conv_general_dilated(x, w, (stride, stride), pad,
                                     dimension_numbers=dn)
        return y + b.reshape(1, -1, 1, 1)

    gelu = lambda v: jax.nn.gelu(v, approximate=False)

    y = conv(x, p["w1"], p["b1"], 1, "SAME")
    mean = jnp.mean(y, axis=(0, 2, 3), keepdims=True)
    var = jnp.mean((y - mean) ** 2, axis=(0, 2, 3), keepdims=True)
    y = (y - mean) * lax.rsqrt(var + _BN_EPS)
    y = y * p["gamma"].reshape(1, -1, 1, 1) + p["beta"].reshape(1, -1, 1, 1)
    y = gelu(y)
    y = conv(y, p["w2"], p["b2"], 1, "SAME") + x
    y = gelu(conv(y, p["wd"], p["bd"], scale, "VALID"))
    y = conv(y, p["wp"], p["bp"], 1, "VALID")
    return y


if __name__ == "__main__":
    N, C, H, W = 2, 4, 16, 16
    num_convs = 2                                    # downsample scale = 4
    key = jax.random.PRNGKey(0)
    k_x, k_p = jax.random.split(key)
    x = jax.random.normal(k_x, (N, C, H, W), jnp.float32)
    params, scale = init_params(k_p, C, num_convs)

    fwd = jax.jit(encoder_forward, static_argnames=("scale",))
    out = jax.block_until_ready(fwd(x, params, scale=scale))
    assert out.shape == (N, C, H // scale, W // scale), out.shape

    ref = jax.block_until_ready(encoder_reference(x, params, scale))
    err = float(jnp.max(jnp.abs(out - ref)))
    assert jnp.allclose(out, ref, atol=2e-4, rtol=2e-4), err

    print("KERNEL_OK")
</pallas_src>

<mosaic_0001>
module attributes {stable_mosaic.version = 11 : i64} {
  func.func @kernel(%arg0: i32, %arg1: memref<4x256xf32, #tpu.memory_space<vmem>>, %arg2: memref<9x4x4xf32, #tpu.memory_space<vmem>>, %arg3: memref<4x1xf32, #tpu.memory_space<vmem>>, %arg4: memref<4x1x256xf32, #tpu.memory_space<vmem>>, %arg5: memref<4x256xf32, #tpu.memory_space<vmem>>, %arg6: memref<1x4x2xf32, #tpu.memory_space<vmem>>) attributes {dimension_semantics = [#tpu.dimension_semantics<parallel>], iteration_bounds = array<i64: 2>, scalar_prefetch = 0 : i64, scratch_operands = 0 : i64, tpu.core_type = #tpu.core_type<tc>, window_params = [{transform_indices = @transform_0, window_bounds = array<i64: 4, 256>}, {pipeline_mode = #tpu.pipeline_mode<synchronous>, transform_indices = @transform_1, window_bounds = array<i64: 9, 4, 4>}, {pipeline_mode = #tpu.pipeline_mode<synchronous>, transform_indices = @transform_2, window_bounds = array<i64: 4, 1>}, {pipeline_mode = #tpu.pipeline_mode<synchronous>, transform_indices = @transform_3, window_bounds = array<i64: 4, 1, 256>}, {transform_indices = @transform_4, window_bounds = array<i64: 4, 256>}, {transform_indices = @transform_5, window_bounds = array<i64: 1, 4, 2>}]} {
    %c0 = arith.constant 0 : index
    %c0_0 = arith.constant 0 : index
    %0 = vector.load %arg1[%c0, %c0_0] : memref<4x256xf32, #tpu.memory_space<vmem>>, vector<4x256xf32>
    %c17_i32 = arith.constant 17 : i32
    %1 = tpu.dynamic_rotate %0 by %c17_i32 dim 1 : vector<4x256xf32>, i32 -> vector<4x256xf32>
    %c0_1 = arith.constant 0 : index
    %c0_2 = arith.constant 0 : index
    %c0_3 = arith.constant 0 : index
    %2 = vector.load %arg4[%c0_1, %c0_2, %c0_3] : memref<4x1x256xf32, #tpu.memory_space<vmem>>, vector<1x1x256xf32>
    %3 = vector.shape_cast %2 : vector<1x1x256xf32> to vector<1x256xf32>
    %c2 = arith.constant 2 : index
    %c0_4 = arith.constant 0 : index
    %c0_5 = arith.constant 0 : index
    %4 = vector.load %arg4[%c2, %c0_4, %c0_5] : memref<4x1x256xf32, #tpu.memory_space<vmem>>, vector<1x1x256xf32>
    %5 = vector.shape_cast %4 : vector<1x1x256xf32> to vector<1x256xf32>
    %6 = arith.mulf %3, %5 : vector<1x256xf32>
    %7 = vector.broadcast %6 : vector<1x256xf32> to vector<4x256xf32>
    %8 = arith.mulf %1, %7 : vector<4x256xf32>
    %c0_6 = arith.constant 0 : index
    %c0_7 = arith.constant 0 : index
    %c0_8 = arith.constant 0 : index
    %9 = vector.load %arg2[%c0_6, %c0_7, %c0_8] : memref<9x4x4xf32, #tpu.memory_space<vmem>>, vector<1x4x4xf32>
    %10 = vector.shape_cast %9 : vector<1x4x4xf32> to vector<4x4xf32>
    %cst = arith.constant dense<0.000000e+00> : vector<4x256xf32>
    %11 = tpu.matmul %10, %8, %cst {dimension_numbers = #tpu.dot_dimension_numbers<[1], [0], [0], [1], [0, 0, 1, 1], [], []>} : vector<4x4xf32>, vector<4x256xf32>, vector<4x256xf32> -> vector<4x256xf32>
    %c16_i32 = arith.constant 16 : i32
    %12 = tpu.dynamic_rotate %0 by %c16_i32 dim 1 : vector<4x256xf32>, i32 -> vector<4x256xf32>
    %c0_9 = arith.constant 0 : index
    %c0_10 = arith.constant 0 : index
    %c0_11 = arith.constant 0 : index
    %13 = vector.load %arg4[%c0_9, %c0_10, %c0_11] : memref<4x1x256xf32, #tpu.memory_space<vmem>>, vector<1x1x256xf32>
    %14 = vector.shape_cast %13 : vector<1x1x256xf32> to vector<1x256xf32>
    %15 = vector.broadcast %14 : vector<1x256xf32> to vector<4x256xf32>
    %16 = arith.mulf %12, %15 : vector<4x256xf32>
    %c1 = arith.constant 1 : index
    %c0_12 = arith.constant 0 : index
    %c0_13 = arith.constant 0 : index
    %17 = vector.load %arg2[%c1, %c0_12, %c0_13] : memref<9x4x4xf32, #tpu.memory_space<vmem>>, vector<1x4x4xf32>
    %18 = vector.shape_cast %17 : vector<1x4x4xf32> to vector<4x4xf32>
    %cst_14 = arith.constant dense<0.000000e+00> : vector<4x256xf32>
    %19 = tpu.matmul %18, %16, %cst_14 {dimension_numbers = #tpu.dot_dimension_numbers<[1], [0], [0], [1], [0, 0, 1, 1], [], []>} : vector<4x4xf32>, vector<4x256xf32>, vector<4x256xf32> -> vector<4x256xf32>
    %20 = arith.addf %11, %19 : vector<4x256xf32>
    %c15_i32 = arith.constant 15 : i32
    %21 = tpu.dynamic_rotate %0 by %c15_i32 dim 1 : vector<4x256xf32>, i32 -> vector<4x256xf32>
    %c0_15 = arith.constant 0 : index
    %c0_16 = arith.constant 0 : index
    %c0_17 = arith.constant 0 : index
    %22 = vector.load %arg4[%c0_15, %c0_16, %c0_17] : memref<4x1x256xf32, #tpu.memory_space<vmem>>, vector<1x1x256xf32>
    %23 = vector.shape_cast %22 : vector<1x1x256xf32> to vector<1x256xf32>
    %c3 = arith.constant 3 : index
    %c0_18 = arith.constant 0 : index
    %c0_19 = arith.constant 0 : index
    %24 = vector.load %arg4[%c3, %c0_18, %c0_19] : memref<4x1x256xf32, #tpu.memory_space<vmem>>, vector<1x1x256xf32>
    %25 = vector.shape_cast %24 : vector<1x1x256xf32> to vector<1x256xf32>
    %26 = arith.mulf %23, %25 : vector<1x256xf32>
    %27 = vector.broadcast %26 : vector<1x256xf32> to vector<4x256xf32>
    %28 = arith.mulf %21, %27 : vector<4x256xf32>
    %c2_20 = arith.constant 2 : index
    %c0_21 = arith.constant 0 : index
    %c0_22 = arith.constant 0 : index
    %29 = vector.load %arg2[%c2_20, %c0_21, %c0_22] : memref<9x4x4xf32, #tpu.memory_space<vmem>>, vector<1x4x4xf32>
    %30 = vector.shape_cast %29 : vector<1x4x4xf32> to vector<4x4xf32>
    %cst_23 = arith.constant dense<0.000000e+00> : vector<4x256xf32>
    %31 = tpu.matmul %30, %28, %cst_23 {dimension_numbers = #tpu.dot_dimension_numbers<[1], [0], [0], [1], [0, 0, 1, 1], [], []>} : vector<4x4xf32>, vector<4x256xf32>, vector<4x256xf32> -> vector<4x256xf32>
    %32 = arith.addf %20, %31 : vector<4x256xf32>
    %c1_i32 = arith.constant 1 : i32
    %33 = tpu.dynamic_rotate %0 by %c1_i32 dim 1 : vector<4x256xf32>, i32 -> vector<4x256xf32>
    %c2_24 = arith.constant 2 : index
    %c0_25 = arith.constant 0 : index
    %c0_26 = arith.constant 0 : index
    %34 = vector.load %arg4[%c2_24, %c0_25, %c0_26] : memref<4x1x256xf32, #tpu.memory_space<vmem>>, vector<1x1x256xf32>
    %35 = vector.shape_cast %34 : vector<1x1x256xf32> to vector<1x256xf32>
    %36 = vector.broadcast %35 : vector<1x256xf32> to vector<4x256xf32>
    %37 = arith.mulf %33, %36 : vector<4x256xf32>
    %c3_27 = arith.constant 3 : index
    %c0_28 = arith.constant 0 : index
    %c0_29 = arith.constant 0 : index
    %38 = vector.load %arg2[%c3_27, %c0_28, %c0_29] : memref<9x4x4xf32, #tpu.memory_space<vmem>>, vector<1x4x4xf32>
    %39 = vector.shape_cast %38 : vector<1x4x4xf32> to vector<4x4xf32>
    %cst_30 = arith.constant dense<0.000000e+00> : vector<4x256xf32>
    %40 = tpu.matmul %39, %37, %cst_30 {dimension_numbers = #tpu.dot_dimension_numbers<[1], [0], [0], [1], [0, 0, 1, 1], [], []>} : vector<4x4xf32>, vector<4x256xf32>, vector<4x256xf32> -> vector<4x256xf32>
    %41 = arith.addf %32, %40 : vector<4x256xf32>
    %c4 = arith.constant 4 : index
    %c0_31 = arith.constant 0 : index
    %c0_32 = arith.constant 0 : index
    %42 = vector.load %arg2[%c4, %c0_31, %c0_32] : memref<9x4x4xf32, #tpu.memory_space<vmem>>, vector<1x4x4xf32>
    %43 = vector.shape_cast %42 : vector<1x4x4xf32> to vector<4x4xf32>
    %cst_33 = arith.constant dense<0.000000e+00> : vector<4x256xf32>
    %44 = tpu.matmul %43, %0, %cst_33 {dimension_numbers = #tpu.dot_dimension_numbers<[1], [0], [0], [1], [0, 0, 1, 1], [], []>} : vector<4x4xf32>, vector<4x256xf32>, vector<4x256xf32> -> vector<4x256xf32>
    %45 = arith.addf %41, %44 : vector<4x256xf32>
    %c255_i32 = arith.constant 255 : i32
    %46 = tpu.dynamic_rotate %0 by %c255_i32 dim 1 : vector<4x256xf32>, i32 -> vector<4x256xf32>
    %c3_34 = arith.constant 3 : index
    %c0_35 = arith.constant 0 : index
    %c0_36 = arith.constant 0 : index
    %47 = vector.load %arg4[%c3_34, %c0_35, %c0_36] : memref<4x1x256xf32, #tpu.memory_space<vmem>>, vector<1x1x256xf32>
    %48 = vector.shape_cast %47 : vector<1x1x256xf32> to vector<1x256xf32>
    %49 = vector.broadcast %48 : vector<1x256xf32> to vector<4x256xf32>
    %50 = arith.mulf %46, %49 : vector<4x256xf32>
    %c5 = arith.constant 5 : index
    %c0_37 = arith.constant 0 : index
    %c0_38 = arith.constant 0 : index
    %51 = vector.load %arg2[%c5, %c0_37, %c0_38] : memref<9x4x4xf32, #tpu.memory_space<vmem>>, vector<1x4x4xf32>
    %52 = vector.shape_cast %51 : vector<1x4x4xf32> to vector<4x4xf32>
    %cst_39 = arith.constant dense<0.000000e+00> : vector<4x256xf32>
    %53 = tpu.matmul %52, %50, %cst_39 {dimension_numbers = #tpu.dot_dimension_numbers<[1], [0], [0], [1], [0, 0, 1, 1], [], []>} : vector<4x4xf32>, vector<4x256xf32>, vector<4x256xf32> -> vector<4x256xf32>
    %54 = arith.addf %45, %53 : vector<4x256xf32>
    %c241_i32 = arith.constant 241 : i32
    %55 = tpu.dynamic_rotate %0 by %c241_i32 dim 1 : vector<4x256xf32>, i32 -> vector<4x256xf32>
    %c1_40 = arith.constant 1 : index
    %c0_41 = arith.constant 0 : index
    %c0_42 = arith.constant 0 : index
    %56 = vector.load %arg4[%c1_40, %c0_41, %c0_42] : memref<4x1x256xf32, #tpu.memory_space<vmem>>, vector<1x1x256xf32>
    %57 = vector.shape_cast %56 : vector<1x1x256xf32> to vector<1x256xf32>
    %c2_43 = arith.constant 2 : index
    %c0_44 = arith.constant 0 : index
    %c0_45 = arith.constant 0 : index
    %58 = vector.load %arg4[%c2_43, %c0_44, %c0_45] : memref<4x1x256xf32, #tpu.memory_space<vmem>>, vector<1x1x256xf32>
    %59 = vector.shape_cast %58 : vector<1x1x256xf32> to vector<1x256xf32>
    %60 = arith.mulf %57, %59 : vector<1x256xf32>
    %61 = vector.broadcast %60 : vector<1x256xf32> to vector<4x256xf32>
    %62 = arith.mulf %55, %61 : vector<4x256xf32>
    %c6 = arith.constant 6 : index
    %c0_46 = arith.constant 0 : index
    %c0_47 = arith.constant 0 : index
    %63 = vector.load %arg2[%c6, %c0_46, %c0_47] : memref<9x4x4xf32, #tpu.memory_space<vmem>>, vector<1x4x4xf32>
    %64 = vector.shape_cast %63 : vector<1x4x4xf32> to vector<4x4xf32>
    %cst_48 = arith.constant dense<0.000000e+00> : vector<4x256xf32>
    %65 = tpu.matmul %64, %62, %cst_48 {dimension_numbers = #tpu.dot_dimension_numbers<[1], [0], [0], [1], [0, 0, 1, 1], [], []>} : vector<4x4xf32>, vector<4x256xf32>, vector<4x256xf32> -> vector<4x256xf32>
    %66 = arith.addf %54, %65 : vector<4x256xf32>
    %c240_i32 = arith.constant 240 : i32
    %67 = tpu.dynamic_rotate %0 by %c240_i32 dim 1 : vector<4x256xf32>, i32 -> vector<4x256xf32>
    %c1_49 = arith.constant 1 : index
    %c0_50 = arith.constant 0 : index
    %c0_51 = arith.constant 0 : index
    %68 = vector.load %arg4[%c1_49, %c0_50, %c0_51] : memref<4x1x256xf32, #tpu.memory_space<vmem>>, vector<1x1x256xf32>
    %69 = vector.shape_cast %68 : vector<1x1x256xf32> to vector<1x256xf32>
    %70 = vector.broadcast %69 : vector<1x256xf32> to vector<4x256xf32>
    %71 = arith.mulf %67, %70 : vector<4x256xf32>
    %c7 = arith.constant 7 : index
    %c0_52 = arith.constant 0 : index
    %c0_53 = arith.constant 0 : index
    %72 = vector.load %arg2[%c7, %c0_52, %c0_53] : memref<9x4x4xf32, #tpu.memory_space<vmem>>, vector<1x4x4xf32>
    %73 = vector.shape_cast %72 : vector<1x4x4xf32> to vector<4x4xf32>
    %cst_54 = arith.constant dense<0.000000e+00> : vector<4x256xf32>
    %74 = tpu.matmul %73, %71, %cst_54 {dimension_numbers = #tpu.dot_dimension_numbers<[1], [0], [0], [1], [0, 0, 1, 1], [], []>} : vector<4x4xf32>, vector<4x256xf32>, vector<4x256xf32> -> vector<4x256xf32>
    %75 = arith.addf %66, %74 : vector<4x256xf32>
    %c239_i32 = arith.constant 239 : i32
    %76 = tpu.dynamic_rotate %0 by %c239_i32 dim 1 : vector<4x256xf32>, i32 -> vector<4x256xf32>
    %c1_55 = arith.constant 1 : index
    %c0_56 = arith.constant 0 : index
    %c0_57 = arith.constant 0 : index
    %77 = vector.load %arg4[%c1_55, %c0_56, %c0_57] : memref<4x1x256xf32, #tpu.memory_space<vmem>>, vector<1x1x256xf32>
    %78 = vector.shape_cast %77 : vector<1x1x256xf32> to vector<1x256xf32>
    %c3_58 = arith.constant 3 : index
    %c0_59 = arith.constant 0 : index
    %c0_60 = arith.constant 0 : index
    %79 = vector.load %arg4[%c3_58, %c0_59, %c0_60] : memref<4x1x256xf32, #tpu.memory_space<vmem>>, vector<1x1x256xf32>
    %80 = vector.shape_cast %79 : vector<1x1x256xf32> to vector<1x256xf32>
    %81 = arith.mulf %78, %80 : vector<1x256xf32>
    %82 = vector.broadcast %81 : vector<1x256xf32> to vector<4x256xf32>
    %83 = arith.mulf %76, %82 : vector<4x256xf32>
    %c8 = arith.constant 8 : index
    %c0_61 = arith.constant 0 : index
    %c0_62 = arith.constant 0 : index
    %84 = vector.load %arg2[%c8, %c0_61, %c0_62] : memref<9x4x4xf32, #tpu.memory_space<vmem>>, vector<1x4x4xf32>
    %85 = vector.shape_cast %84 : vector<1x4x4xf32> to vector<4x4xf32>
    %cst_63 = arith.constant dense<0.000000e+00> : vector<4x256xf32>
    %86 = tpu.matmul %85, %83, %cst_63 {dimension_numbers = #tpu.dot_dimension_numbers<[1], [0], [0], [1], [0, 0, 1, 1], [], []>} : vector<4x4xf32>, vector<4x256xf32>, vector<4x256xf32> -> vector<4x256xf32>
    %87 = arith.addf %75, %86 : vector<4x256xf32>
    %c0_64 = arith.constant 0 : index
    %c0_65 = arith.constant 0 : index
    %88 = vector.load %arg3[%c0_64, %c0_65] : memref<4x1xf32, #tpu.memory_space<vmem>>, vector<4x1xf32>
    %89 = vector.broadcast %88 : vector<4x1xf32> to vector<4x256xf32>
    %90 = arith.addf %87, %89 : vector<4x256xf32>
    %c0_66 = arith.constant 0 : index
    %c0_67 = arith.constant 0 : index
    %91 = vector.load %arg5[%c0_66, %c0_67] : memref<4x256xf32, #tpu.memory_space<vmem>>, vector<4x256xf32>
    tpu.vector_store %arg5[%c0_66, %c0_67], %90 {strides = array<i32>} : memref<4x256xf32, #tpu.memory_space<vmem>>, vector<4x256xf32>,
    %cst_68 = arith.constant dense<0.000000e+00> : vector<4xf32>
    %92 = vector.multi_reduction <add>, %90, %cst_68 [1] : vector<4x256xf32> to vector<4xf32>
    %93 = vector.shape_cast %92 : vector<4xf32> to vector<4x1xf32>
    %cst_69 = arith.constant 3.906250e-03 : f32
    %94 = vector.broadcast %cst_69 : f32 to vector<4x1xf32>
    %95 = arith.mulf %93, %94 : vector<4x1xf32>
    %96 = vector.broadcast %95 : vector<4x1xf32> to vector<4x256xf32>
    %97 = arith.subf %90, %96 : vector<4x256xf32>
    %98 = arith.mulf %97, %97 : vector<4x256xf32>
    %cst_70 = arith.constant dense<0.000000e+00> : vector<4xf32>
    %99 = vector.multi_reduction <add>, %98, %cst_70 [1] : vector<4x256xf32> to vector<4xf32>
    %100 = vector.shape_cast %99 : vector<4xf32> to vector<4x1xf32>
    %101 = tpu.concatenate %95, %100 in 1 : vector<4x1xf32>, vector<4x1xf32> -> vector<4x2xf32>
    %102 = vector.shape_cast %101 : vector<4x2xf32> to vector<1x4x2xf32>
    %c0_71 = arith.constant 0 : index
    %c0_72 = arith.constant 0 : index
    %c0_73 = arith.constant 0 : index
    %103 = vector.load %arg6[%c0_71, %c0_72, %c0_73] : memref<1x4x2xf32, #tpu.memory_space<vmem>>, vector<1x4x2xf32>
    tpu.vector_store %arg6[%c0_71, %c0_72, %c0_73], %102 {strides = array<i32>} : memref<1x4x2xf32, #tpu.memory_space<vmem>>, vector<1x4x2xf32>,
    return
  }
  func.func @transform_0(%arg0: i32) -> (i32, i32) {
    %c0_i32 = arith.constant 0 : i32
    %c0_i32_0 = arith.constant 0 : i32
    return %c0_i32, %arg0 : i32, i32
  }
  func.func @transform_1(%arg0: i32) -> (i32, i32, i32) {
    %c0_i32 = arith.constant 0 : i32
    %c0_i32_0 = arith.constant 0 : i32
    %c0_i32_1 = arith.constant 0 : i32
    %c0_i32_2 = arith.constant 0 : i32
    return %c0_i32, %c0_i32_0, %c0_i32_1 : i32, i32, i32
  }
  func.func @transform_2(%arg0: i32) -> (i32, i32) {
    %c0_i32 = arith.constant 0 : i32
    %c0_i32_0 = arith.constant 0 : i32
    %c0_i32_1 = arith.constant 0 : i32
    return %c0_i32, %c0_i32_0 : i32, i32
  }
  func.func @transform_3(%arg0: i32) -> (i32, i32, i32) {
    %c0_i32 = arith.constant 0 : i32
    %c0_i32_0 = arith.constant 0 : i32
    %c0_i32_1 = arith.constant 0 : i32
    %c0_i32_2 = arith.constant 0 : i32
    return %c0_i32, %c0_i32_0, %c0_i32_1 : i32, i32, i32
  }
  func.func @transform_4(%arg0: i32) -> (i32, i32) {
    %c0_i32 = arith.constant 0 : i32
    %c0_i32_0 = arith.constant 0 : i32
    return %c0_i32, %arg0 : i32, i32
  }
  func.func @transform_5(%arg0: i32) -> (i32, i32, i32) {
    %c0_i32 = arith.constant 0 : i32
    %c0_i32_0 = arith.constant 0 : i32
    %c0_i32_1 = arith.constant 0 : i32
    return %arg0, %c0_i32, %c0_i32_0 : i32, i32, i32
  }
}

module attributes {stable_mosaic.version = 11 : i64} {
  func.func @kernel(%arg0: i32, %arg1: memref<4x256xf32, #tpu.memory_space<vmem>>, %arg2: memref<4x256xf32, #tpu.memory_space<vmem>>, %arg3: memref<9x4x4xf32, #tpu.memory_space<vmem>>, %arg4: memref<4x1xf32, #tpu.memory_space<vmem>>, %arg5: memref<4x1xf32, #tpu.memory_space<vmem>>, %arg6: memref<4x1xf32, #tpu.memory_space<vmem>>, %arg7: memref<4x1x256xf32, #tpu.memory_space<vmem>>, %arg8: memref<4x256xf32, #tpu.memory_space<vmem>>) attributes {dimension_semantics = [#tpu.dimension_semantics<parallel>], iteration_bounds = array<i64: 2>, scalar_prefetch = 0 : i64, scratch_operands = 0 : i64, tpu.core_type = #tpu.core_type<tc>, window_params = [{transform_indices = @transform_0, window_bounds = array<i64: 4, 256>}, {transform_indices = @transform_1, window_bounds = array<i64: 4, 256>}, {pipeline_mode = #tpu.pipeline_mode<synchronous>, transform_indices = @transform_2, window_bounds = array<i64: 9, 4, 4>}, {pipeline_mode = #tpu.pipeline_mode<synchronous>, transform_indices = @transform_3, window_bounds = array<i64: 4, 1>}, {pipeline_mode = #tpu.pipeline_mode<synchronous>, transform_indices = @transform_4, window_bounds = array<i64: 4, 1>}, {pipeline_mode = #tpu.pipeline_mode<synchronous>, transform_indices = @transform_5, window_bounds = array<i64: 4, 1>}, {pipeline_mode = #tpu.pipeline_mode<synchronous>, transform_indices = @transform_6, window_bounds = array<i64: 4, 1, 256>}, {transform_indices = @transform_7, window_bounds = array<i64: 4, 256>}]} {
    %c0 = arith.constant 0 : index
    %c0_0 = arith.constant 0 : index
    %0 = vector.load %arg1[%c0, %c0_0] : memref<4x256xf32, #tpu.memory_space<vmem>>, vector<4x256xf32>
    %c0_1 = arith.constant 0 : index
    %c0_2 = arith.constant 0 : index
    %1 = vector.load %arg5[%c0_1, %c0_2] : memref<4x1xf32, #tpu.memory_space<vmem>>, vector<4x1xf32>
    %2 = vector.broadcast %1 : vector<4x1xf32> to vector<4x256xf32>
    %3 = arith.mulf %0, %2 : vector<4x256xf32>
    %c0_3 = arith.constant 0 : index
    %c0_4 = arith.constant 0 : index
    %4 = vector.load %arg6[%c0_3, %c0_4] : memref<4x1xf32, #tpu.memory_space<vmem>>, vector<4x1xf32>
    %5 = vector.broadcast %4 : vector<4x1xf32> to vector<4x256xf32>
    %6 = arith.addf %3, %5 : vector<4x256xf32>
    %cst = arith.constant 5.000000e-01 : f32
    %7 = vector.broadcast %cst : f32 to vector<4x256xf32>
    %8 = arith.mulf %7, %6 : vector<4x256xf32>
    %cst_5 = arith.constant 0.707106769 : f32
    %9 = vector.broadcast %cst_5 : f32 to vector<4x256xf32>
    %10 = arith.mulf %6, %9 : vector<4x256xf32>
    %11 = math.erf %10 : vector<4x256xf32>
    %cst_6 = arith.constant 1.000000e+00 : f32
    %12 = vector.broadcast %cst_6 : f32 to vector<4x256xf32>
    %13 = arith.addf %12, %11 : vector<4x256xf32>
    %14 = arith.mulf %8, %13 : vector<4x256xf32>
    %c17_i32 = arith.constant 17 : i32
    %15 = tpu.dynamic_rotate %14 by %c17_i32 dim 1 : vector<4x256xf32>, i32 -> vector<4x256xf32>
    %c0_7 = arith.constant 0 : index
    %c0_8 = arith.constant 0 : index
    %c0_9 = arith.constant 0 : index
    %16 = vector.load %arg7[%c0_7, %c0_8, %c0_9] : memref<4x1x256xf32, #tpu.memory_space<vmem>>, vector<1x1x256xf32>
    %17 = vector.shape_cast %16 : vector<1x1x256xf32> to vector<1x256xf32>
    %c2 = arith.constant 2 : index
    %c0_10 = arith.constant 0 : index
    %c0_11 = arith.constant 0 : index
    %18 = vector.load %arg7[%c2, %c0_10, %c0_11] : memref<4x1x256xf32, #tpu.memory_space<vmem>>, vector<1x1x256xf32>
    %19 = vector.shape_cast %18 : vector<1x1x256xf32> to vector<1x256xf32>
    %20 = arith.mulf %17, %19 : vector<1x256xf32>
    %21 = vector.broadcast %20 : vector<1x256xf32> to vector<4x256xf32>
    %22 = arith.mulf %15, %21 : vector<4x256xf32>
    %c0_12 = arith.constant 0 : index
    %c0_13 = arith.constant 0 : index
    %c0_14 = arith.constant 0 : index
    %23 = vector.load %arg3[%c0_12, %c0_13, %c0_14] : memref<9x4x4xf32, #tpu.memory_space<vmem>>, vector<1x4x4xf32>
    %24 = vector.shape_cast %23 : vector<1x4x4xf32> to vector<4x4xf32>
    %cst_15 = arith.constant dense<0.000000e+00> : vector<4x256xf32>
    %25 = tpu.matmul %24, %22, %cst_15 {dimension_numbers = #tpu.dot_dimension_numbers<[1], [0], [0], [1], [0, 0, 1, 1], [], []>} : vector<4x4xf32>, vector<4x256xf32>, vector<4x256xf32> -> vector<4x256xf32>
    %c16_i32 = arith.constant 16 : i32
    %26 = tpu.dynamic_rotate %14 by %c16_i32 dim 1 : vector<4x256xf32>, i32 -> vector<4x256xf32>
    %c0_16 = arith.constant 0 : index
    %c0_17 = arith.constant 0 : index
    %c0_18 = arith.constant 0 : index
    %27 = vector.load %arg7[%c0_16, %c0_17, %c0_18] : memref<4x1x256xf32, #tpu.memory_space<vmem>>, vector<1x1x256xf32>
    %28 = vector.shape_cast %27 : vector<1x1x256xf32> to vector<1x256xf32>
    %29 = vector.broadcast %28 : vector<1x256xf32> to vector<4x256xf32>
    %30 = arith.mulf %26, %29 : vector<4x256xf32>
    %c1 = arith.constant 1 : index
    %c0_19 = arith.constant 0 : index
    %c0_20 = arith.constant 0 : index
    %31 = vector.load %arg3[%c1, %c0_19, %c0_20] : memref<9x4x4xf32, #tpu.memory_space<vmem>>, vector<1x4x4xf32>
    %32 = vector.shape_cast %31 : vector<1x4x4xf32> to vector<4x4xf32>
    %cst_21 = arith.constant dense<0.000000e+00> : vector<4x256xf32>
    %33 = tpu.matmul %32, %30, %cst_21 {dimension_numbers = #tpu.dot_dimension_numbers<[1], [0], [0], [1], [0, 0, 1, 1], [], []>} : vector<4x4xf32>, vector<4x256xf32>, vector<4x256xf32> -> vector<4x256xf32>
    %34 = arith.addf %25, %33 : vector<4x256xf32>
    %c15_i32 = arith.constant 15 : i32
    %35 = tpu.dynamic_rotate %14 by %c15_i32 dim 1 : vector<4x256xf32>, i32 -> vector<4x256xf32>
    %c0_22 = arith.constant 0 : index
    %c0_23 = arith.constant 0 : index
    %c0_24 = arith.constant 0 : index
    %36 = vector.load %arg7[%c0_22, %c0_23, %c0_24] : memref<4x1x256xf32, #tpu.memory_space<vmem>>, vector<1x1x256xf32>
    %37 = vector.shape_cast %36 : vector<1x1x256xf32> to vector<1x256xf32>
    %c3 = arith.constant 3 : index
    %c0_25 = arith.constant 0 : index
    %c0_26 = arith.constant 0 : index
    %38 = vector.load %arg7[%c3, %c0_25, %c0_26] : memref<4x1x256xf32, #tpu.memory_space<vmem>>, vector<1x1x256xf32>
    %39 = vector.shape_cast %38 : vector<1x1x256xf32> to vector<1x256xf32>
    %40 = arith.mulf %37, %39 : vector<1x256xf32>
    %41 = vector.broadcast %40 : vector<1x256xf32> to vector<4x256xf32>
    %42 = arith.mulf %35, %41 : vector<4x256xf32>
    %c2_27 = arith.constant 2 : index
    %c0_28 = arith.constant 0 : index
    %c0_29 = arith.constant 0 : index
    %43 = vector.load %arg3[%c2_27, %c0_28, %c0_29] : memref<9x4x4xf32, #tpu.memory_space<vmem>>, vector<1x4x4xf32>
    %44 = vector.shape_cast %43 : vector<1x4x4xf32> to vector<4x4xf32>
    %cst_30 = arith.constant dense<0.000000e+00> : vector<4x256xf32>
    %45 = tpu.matmul %44, %42, %cst_30 {dimension_numbers = #tpu.dot_dimension_numbers<[1], [0], [0], [1], [0, 0, 1, 1], [], []>} : vector<4x4xf32>, vector<4x256xf32>, vector<4x256xf32> -> vector<4x256xf32>
    %46 = arith.addf %34, %45 : vector<4x256xf32>
    %c1_i32 = arith.constant 1 : i32
    %47 = tpu.dynamic_rotate %14 by %c1_i32 dim 1 : vector<4x256xf32>, i32 -> vector<4x256xf32>
    %c2_31 = arith.constant 2 : index
    %c0_32 = arith.constant 0 : index
    %c0_33 = arith.constant 0 : index
    %48 = vector.load %arg7[%c2_31, %c0_32, %c0_33] : memref<4x1x256xf32, #tpu.memory_space<vmem>>, vector<1x1x256xf32>
    %49 = vector.shape_cast %48 : vector<1x1x256xf32> to vector<1x256xf32>
    %50 = vector.broadcast %49 : vector<1x256xf32> to vector<4x256xf32>
    %51 = arith.mulf %47, %50 : vector<4x256xf32>
    %c3_34 = arith.constant 3 : index
    %c0_35 = arith.constant 0 : index
    %c0_36 = arith.constant 0 : index
    %52 = vector.load %arg3[%c3_34, %c0_35, %c0_36] : memref<9x4x4xf32, #tpu.memory_space<vmem>>, vector<1x4x4xf32>
    %53 = vector.shape_cast %52 : vector<1x4x4xf32> to vector<4x4xf32>
    %cst_37 = arith.constant dense<0.000000e+00> : vector<4x256xf32>
    %54 = tpu.matmul %53, %51, %cst_37 {dimension_numbers = #tpu.dot_dimension_numbers<[1], [0], [0], [1], [0, 0, 1, 1], [], []>} : vector<4x4xf32>, vector<4x256xf32>, vector<4x256xf32> -> vector<4x256xf32>
    %55 = arith.addf %46, %54 : vector<4x256xf32>
    %c4 = arith.constant 4 : index
    %c0_38 = arith.constant 0 : index
    %c0_39 = arith.constant 0 : index
    %56 = vector.load %arg3[%c4, %c0_38, %c0_39] : memref<9x4x4xf32, #tpu.memory_space<vmem>>, vector<1x4x4xf32>
    %57 = vector.shape_cast %56 : vector<1x4x4xf32> to vector<4x4xf32>
    %cst_40 = arith.constant dense<0.000000e+00> : vector<4x256xf32>
    %58 = tpu.matmul %57, %14, %cst_40 {dimension_numbers = #tpu.dot_dimension_numbers<[1], [0], [0], [1], [0, 0, 1, 1], [], []>} : vector<4x4xf32>, vector<4x256xf32>, vector<4x256xf32> -> vector<4x256xf32>
    %59 = arith.addf %55, %58 : vector<4x256xf32>
    %c255_i32 = arith.constant 255 : i32
    %60 = tpu.dynamic_rotate %14 by %c255_i32 dim 1 : vector<4x256xf32>, i32 -> vector<4x256xf32>
    %c3_41 = arith.constant 3 : index
    %c0_42 = arith.constant 0 : index
    %c0_43 = arith.constant 0 : index
    %61 = vector.load %arg7[%c3_41, %c0_42, %c0_43] : memref<4x1x256xf32, #tpu.memory_space<vmem>>, vector<1x1x256xf32>
    %62 = vector.shape_cast %61 : vector<1x1x256xf32> to vector<1x256xf32>
    %63 = vector.broadcast %62 : vector<1x256xf32> to vector<4x256xf32>
    %64 = arith.mulf %60, %63 : vector<4x256xf32>
    %c5 = arith.constant 5 : index
    %c0_44 = arith.constant 0 : index
    %c0_45 = arith.constant 0 : index
    %65 = vector.load %arg3[%c5, %c0_44, %c0_45] : memref<9x4x4xf32, #tpu.memory_space<vmem>>, vector<1x4x4xf32>
    %66 = vector.shape_cast %65 : vector<1x4x4xf32> to vector<4x4xf32>
    %cst_46 = arith.constant dense<0.000000e+00> : vector<4x256xf32>
    %67 = tpu.matmul %66, %64, %cst_46 {dimension_numbers = #tpu.dot_dimension_numbers<[1], [0], [0], [1], [0, 0, 1, 1], [], []>} : vector<4x4xf32>, vector<4x256xf32>, vector<4x256xf32> -> vector<4x256xf32>
    %68 = arith.addf %59, %67 : vector<4x256xf32>
    %c241_i32 = arith.constant 241 : i32
    %69 = tpu.dynamic_rotate %14 by %c241_i32 dim 1 : vector<4x256xf32>, i32 -> vector<4x256xf32>
    %c1_47 = arith.constant 1 : index
    %c0_48 = arith.constant 0 : index
    %c0_49 = arith.constant 0 : index
    %70 = vector.load %arg7[%c1_47, %c0_48, %c0_49] : memref<4x1x256xf32, #tpu.memory_space<vmem>>, vector<1x1x256xf32>
    %71 = vector.shape_cast %70 : vector<1x1x256xf32> to vector<1x256xf32>
    %c2_50 = arith.constant 2 : index
    %c0_51 = arith.constant 0 : index
    %c0_52 = arith.constant 0 : index
    %72 = vector.load %arg7[%c2_50, %c0_51, %c0_52] : memref<4x1x256xf32, #tpu.memory_space<vmem>>, vector<1x1x256xf32>
    %73 = vector.shape_cast %72 : vector<1x1x256xf32> to vector<1x256xf32>
    %74 = arith.mulf %71, %73 : vector<1x256xf32>
    %75 = vector.broadcast %74 : vector<1x256xf32> to vector<4x256xf32>
    %76 = arith.mulf %69, %75 : vector<4x256xf32>
    %c6 = arith.constant 6 : index
    %c0_53 = arith.constant 0 : index
    %c0_54 = arith.constant 0 : index
    %77 = vector.load %arg3[%c6, %c0_53, %c0_54] : memref<9x4x4xf32, #tpu.memory_space<vmem>>, vector<1x4x4xf32>
    %78 = vector.shape_cast %77 : vector<1x4x4xf32> to vector<4x4xf32>
    %cst_55 = arith.constant dense<0.000000e+00> : vector<4x256xf32>
    %79 = tpu.matmul %78, %76, %cst_55 {dimension_numbers = #tpu.dot_dimension_numbers<[1], [0], [0], [1], [0, 0, 1, 1], [], []>} : vector<4x4xf32>, vector<4x256xf32>, vector<4x256xf32> -> vector<4x256xf32>
    %80 = arith.addf %68, %79 : vector<4x256xf32>
    %c240_i32 = arith.constant 240 : i32
    %81 = tpu.dynamic_rotate %14 by %c240_i32 dim 1 : vector<4x256xf32>, i32 -> vector<4x256xf32>
    %c1_56 = arith.constant 1 : index
    %c0_57 = arith.constant 0 : index
    %c0_58 = arith.constant 0 : index
    %82 = vector.load %arg7[%c1_56, %c0_57, %c0_58] : memref<4x1x256xf32, #tpu.memory_space<vmem>>, vector<1x1x256xf32>
    %83 = vector.shape_cast %82 : vector<1x1x256xf32> to vector<1x256xf32>
    %84 = vector.broadcast %83 : vector<1x256xf32> to vector<4x256xf32>
    %85 = arith.mulf %81, %84 : vector<4x256xf32>
    %c7 = arith.constant 7 : index
    %c0_59 = arith.constant 0 : index
    %c0_60 = arith.constant 0 : index
    %86 = vector.load %arg3[%c7, %c0_59, %c0_60] : memref<9x4x4xf32, #tpu.memory_space<vmem>>, vector<1x4x4xf32>
    %87 = vector.shape_cast %86 : vector<1x4x4xf32> to vector<4x4xf32>
    %cst_61 = arith.constant dense<0.000000e+00> : vector<4x256xf32>
    %88 = tpu.matmul %87, %85, %cst_61 {dimension_numbers = #tpu.dot_dimension_numbers<[1], [0], [0], [1], [0, 0, 1, 1], [], []>} : vector<4x4xf32>, vector<4x256xf32>, vector<4x256xf32> -> vector<4x256xf32>
    %89 = arith.addf %80, %88 : vector<4x256xf32>
    %c239_i32 = arith.constant 239 : i32
    %90 = tpu.dynamic_rotate %14 by %c239_i32 dim 1 : vector<4x256xf32>, i32 -> vector<4x256xf32>
    %c1_62 = arith.constant 1 : index
    %c0_63 = arith.constant 0 : index
    %c0_64 = arith.constant 0 : index
    %91 = vector.load %arg7[%c1_62, %c0_63, %c0_64] : memref<4x1x256xf32, #tpu.memory_space<vmem>>, vector<1x1x256xf32>
    %92 = vector.shape_cast %91 : vector<1x1x256xf32> to vector<1x256xf32>
    %c3_65 = arith.constant 3 : index
    %c0_66 = arith.constant 0 : index
    %c0_67 = arith.constant 0 : index
    %93 = vector.load %arg7[%c3_65, %c0_66, %c0_67] : memref<4x1x256xf32, #tpu.memory_space<vmem>>, vector<1x1x256xf32>
    %94 = vector.shape_cast %93 : vector<1x1x256xf32> to vector<1x256xf32>
    %95 = arith.mulf %92, %94 : vector<1x256xf32>
    %96 = vector.broadcast %95 : vector<1x256xf32> to vector<4x256xf32>
    %97 = arith.mulf %90, %96 : vector<4x256xf32>
    %c8 = arith.constant 8 : index
    %c0_68 = arith.constant 0 : index
    %c0_69 = arith.constant 0 : index
    %98 = vector.load %arg3[%c8, %c0_68, %c0_69] : memref<9x4x4xf32, #tpu.memory_space<vmem>>, vector<1x4x4xf32>
    %99 = vector.shape_cast %98 : vector<1x4x4xf32> to vector<4x4xf32>
    %cst_70 = arith.constant dense<0.000000e+00> : vector<4x256xf32>
    %100 = tpu.matmul %99, %97, %cst_70 {dimension_numbers = #tpu.dot_dimension_numbers<[1], [0], [0], [1], [0, 0, 1, 1], [], []>} : vector<4x4xf32>, vector<4x256xf32>, vector<4x256xf32> -> vector<4x256xf32>
    %101 = arith.addf %89, %100 : vector<4x256xf32>
    %c0_71 = arith.constant 0 : index
    %c0_72 = arith.constant 0 : index
    %102 = vector.load %arg4[%c0_71, %c0_72] : memref<4x1xf32, #tpu.memory_space<vmem>>, vector<4x1xf32>
    %103 = vector.broadcast %102 : vector<4x1xf32> to vector<4x256xf32>
    %104 = arith.addf %101, %103 : vector<4x256xf32>
    %c0_73 = arith.constant 0 : index
    %c0_74 = arith.constant 0 : index
    %105 = vector.load %arg2[%c0_73, %c0_74] : memref<4x256xf32, #tpu.memory_space<vmem>>, vector<4x256xf32>
    %106 = arith.addf %104, %105 : vector<4x256xf32>
    %c0_75 = arith.constant 0 : index
    %c0_76 = arith.constant 0 : index
    %107 = vector.load %arg8[%c0_75, %c0_76] : memref<4x256xf32, #tpu.memory_space<vmem>>, vector<4x256xf32>
    tpu.vector_store %arg8[%c0_75, %c0_76], %106 {strides = array<i32>} : memref<4x256xf32, #tpu.memory_space<vmem>>, vector<4x256xf32>,
    return
  }
  func.func @transform_0(%arg0: i32) -> (i32, i32) {
    %c0_i32 = arith.constant 0 : i32
    %c0_i32_0 = arith.constant 0 : i32
    return %c0_i32, %arg0 : i32, i32
  }
  func.func @transform_1(%arg0: i32) -> (i32, i32) {
    %c0_i32 = arith.constant 0 : i32
    %c0_i32_0 = arith.constant 0 : i32
    return %c0_i32, %arg0 : i32, i32
  }
  func.func @transform_2(%arg0: i32) -> (i32, i32, i32) {
    %c0_i32 = arith.constant 0 : i32
    %c0_i32_0 = arith.constant 0 : i32
    %c0_i32_1 = arith.constant 0 : i32
    %c0_i32_2 = arith.constant 0 : i32
    return %c0_i32, %c0_i32_0, %c0_i32_1 : i32, i32, i32
  }
  func.func @transform_3(%arg0: i32) -> (i32, i32) {
    %c0_i32 = arith.constant 0 : i32
    %c0_i32_0 = arith.constant 0 : i32
    %c0_i32_1 = arith.constant 0 : i32
    return %c0_i32, %c0_i32_0 : i32, i32
  }
  func.func @transform_4(%arg0: i32) -> (i32, i32) {
    %c0_i32 = arith.constant 0 : i32
    %c0_i32_0 = arith.constant 0 : i32
    %c0_i32_1 = arith.constant 0 : i32
    return %c0_i32, %c0_i32_0 : i32, i32
  }
  func.func @transform_5(%arg0: i32) -> (i32, i32) {
    %c0_i32 = arith.constant 0 : i32
    %c0_i32_0 = arith.constant 0 : i32
    %c0_i32_1 = arith.constant 0 : i32
    return %c0_i32, %c0_i32_0 : i32, i32
  }
  func.func @transform_6(%arg0: i32) -> (i32, i32, i32) {
    %c0_i32 = arith.constant 0 : i32
    %c0_i32_0 = arith.constant 0 : i32
    %c0_i32_1 = arith.constant 0 : i32
    %c0_i32_2 = arith.constant 0 : i32
    return %c0_i32, %c0_i32_0, %c0_i32_1 : i32, i32, i32
  }
  func.func @transform_7(%arg0: i32) -> (i32, i32) {
    %c0_i32 = arith.constant 0 : i32
    %c0_i32_0 = arith.constant 0 : i32
    return %c0_i32, %arg0 : i32, i32
  }
}

module attributes {stable_mosaic.version = 11 : i64} {
  func.func @down_proj_kernel(%arg0: i32, %arg1: memref<64x32xf32, #tpu.memory_space<vmem>>, %arg2: memref<4x64xf32, #tpu.memory_space<vmem>>, %arg3: memref<4x1xf32, #tpu.memory_space<vmem>>, %arg4: memref<4x4xf32, #tpu.memory_space<vmem>>, %arg5: memref<4x1xf32, #tpu.memory_space<vmem>>, %arg6: memref<4x32xf32, #tpu.memory_space<vmem>>) attributes {dimension_semantics = [#tpu.dimension_semantics<parallel>], iteration_bounds = array<i64: 1>, scalar_prefetch = 0 : i64, scratch_operands = 0 : i64, tpu.core_type = #tpu.core_type<tc>, window_params = [{pipeline_mode = #tpu.pipeline_mode<synchronous>, transform_indices = @transform_0, window_bounds = array<i64: 64, 32>}, {pipeline_mode = #tpu.pipeline_mode<synchronous>, transform_indices = @transform_1, window_bounds = array<i64: 4, 64>}, {pipeline_mode = #tpu.pipeline_mode<synchronous>, transform_indices = @transform_2, window_bounds = array<i64: 4, 1>}, {pipeline_mode = #tpu.pipeline_mode<synchronous>, transform_indices = @transform_3, window_bounds = array<i64: 4, 4>}, {pipeline_mode = #tpu.pipeline_mode<synchronous>, transform_indices = @transform_4, window_bounds = array<i64: 4, 1>}, {pipeline_mode = #tpu.pipeline_mode<synchronous>, transform_indices = @transform_5, window_bounds = array<i64: 4, 32>}]} {
    %c0 = arith.constant 0 : index
    %c0_0 = arith.constant 0 : index
    %0 = vector.load %arg2[%c0, %c0_0] : memref<4x64xf32, #tpu.memory_space<vmem>>, vector<4x64xf32>
    %c0_1 = arith.constant 0 : index
    %c0_2 = arith.constant 0 : index
    %1 = vector.load %arg1[%c0_1, %c0_2] : memref<64x32xf32, #tpu.memory_space<vmem>>, vector<64x32xf32>
    %cst = arith.constant dense<0.000000e+00> : vector<4x32xf32>
    %2 = tpu.matmul %0, %1, %cst {dimension_numbers = #tpu.dot_dimension_numbers<[1], [0], [0], [1], [0, 0, 1, 1], [], []>} : vector<4x64xf32>, vector<64x32xf32>, vector<4x32xf32> -> vector<4x32xf32>
    %c0_3 = arith.constant 0 : index
    %c0_4 = arith.constant 0 : index
    %3 = vector.load %arg3[%c0_3, %c0_4] : memref<4x1xf32, #tpu.memory_space<vmem>>, vector<4x1xf32>
    %4 = vector.broadcast %3 : vector<4x1xf32> to vector<4x32xf32>
    %5 = arith.addf %2, %4 : vector<4x32xf32>
    %cst_5 = arith.constant 5.000000e-01 : f32
    %6 = vector.broadcast %cst_5 : f32 to vector<4x32xf32>
    %7 = arith.mulf %6, %5 : vector<4x32xf32>
    %cst_6 = arith.constant 0.707106769 : f32
    %8 = vector.broadcast %cst_6 : f32 to vector<4x32xf32>
    %9 = arith.mulf %5, %8 : vector<4x32xf32>
    %10 = math.erf %9 : vector<4x32xf32>
    %cst_7 = arith.constant 1.000000e+00 : f32
    %11 = vector.broadcast %cst_7 : f32 to vector<4x32xf32>
    %12 = arith.addf %11, %10 : vector<4x32xf32>
    %13 = arith.mulf %7, %12 : vector<4x32xf32>
    %c0_8 = arith.constant 0 : index
    %c0_9 = arith.constant 0 : index
    %14 = vector.load %arg4[%c0_8, %c0_9] : memref<4x4xf32, #tpu.memory_space<vmem>>, vector<4x4xf32>
    %cst_10 = arith.constant dense<0.000000e+00> : vector<4x32xf32>
    %15 = tpu.matmul %14, %13, %cst_10 {dimension_numbers = #tpu.dot_dimension_numbers<[1], [0], [0], [1], [0, 0, 1, 1], [], []>} : vector<4x4xf32>, vector<4x32xf32>, vector<4x32xf32> -> vector<4x32xf32>
    %c0_11 = arith.constant 0 : index
    %c0_12 = arith.constant 0 : index
    %16 = vector.load %arg5[%c0_11, %c0_12] : memref<4x1xf32, #tpu.memory_space<vmem>>, vector<4x1xf32>
    %17 = vector.broadcast %16 : vector<4x1xf32> to vector<4x32xf32>
    %18 = arith.addf %15, %17 : vector<4x32xf32>
    %c0_13 = arith.constant 0 : index
    %c0_14 = arith.constant 0 : index
    %19 = vector.load %arg6[%c0_13, %c0_14] : memref<4x32xf32, #tpu.memory_space<vmem>>, vector<4x32xf32>
    tpu.vector_store %arg6[%c0_13, %c0_14], %18 {strides = array<i32>} : memref<4x32xf32, #tpu.memory_space<vmem>>, vector<4x32xf32>,
    return
  }
  func.func @transform_0(%arg0: i32) -> (i32, i32) {
    %c0_i32 = arith.constant 0 : i32
    %c0_i32_0 = arith.constant 0 : i32
    %c0_i32_1 = arith.constant 0 : i32
    return %c0_i32, %c0_i32_0 : i32, i32
  }
  func.func @transform_1(%arg0: i32) -> (i32, i32) {
    %c0_i32 = arith.constant 0 : i32
    %c0_i32_0 = arith.constant 0 : i32
    %c0_i32_1 = arith.constant 0 : i32
    return %c0_i32, %c0_i32_0 : i32, i32
  }
  func.func @transform_2(%arg0: i32) -> (i32, i32) {
    %c0_i32 = arith.constant 0 : i32
    %c0_i32_0 = arith.constant 0 : i32
    %c0_i32_1 = arith.constant 0 : i32
    return %c0_i32, %c0_i32_0 : i32, i32
  }
  func.func @transform_3(%arg0: i32) -> (i32, i32) {
    %c0_i32 = arith.constant 0 : i32
    %c0_i32_0 = arith.constant 0 : i32
    %c0_i32_1 = arith.constant 0 : i32
    return %c0_i32, %c0_i32_0 : i32, i32
  }
  func.func @transform_4(%arg0: i32) -> (i32, i32) {
    %c0_i32 = arith.constant 0 : i32
    %c0_i32_0 = arith.constant 0 : i32
    %c0_i32_1 = arith.constant 0 : i32
    return %c0_i32, %c0_i32_0 : i32, i32
  }
  func.func @transform_5(%arg0: i32) -> (i32, i32) {
    %c0_i32 = arith.constant 0 : i32
    %c0_i32_0 = arith.constant 0 : i32
    %c0_i32_1 = arith.constant 0 : i32
    return %c0_i32, %c0_i32_0 : i32, i32
  }
}

</mosaic_0001>

<bundles_post_ra>
// kernel: encoder_forward.3
= control target key start
LH: loop header
LB: loop body
LE: loop exit
PB: predicated region body
PF: predicated region fallthrough
CT: control target
= control target key end

     0   :  { %s1126_s18 = smov 0   ;;  %s1269_s0 = inlined_call_operand.vmem [shape: f32[4,512], index: 0, kind: input, shape index: {}]   ;;  %s1270_s1 = inlined_call_operand.vmem [shape: f32[9,4,4], index: 1, kind: input, shape index: {}]   ;;  %s1271_s2 = inlined_call_operand.vmem [shape: f32[4,1], index: 2, kind: input, shape index: {}]   ;;  %s1272_s3 = inlined_call_operand.vmem [shape: f32[4,1,256], index: 3, kind: input, shape index: {}]   ;;  %s1273_s4 = inlined_call_operand.vmem [shape: f32[4,512], index: 4, kind: output, shape index: {0}]   ;;  %s1274_s5 = inlined_call_operand.vmem [shape: f32[2,4,2], index: 5, kind: output, shape index: {1}]  }
   0x1 LB: > { %s1132_s19 = sadd.s32 4294967295, %s1085_s18   ;;  %p1005_p0 = scmp.ge.s32.totalorder %s1085_s18, 1  ;;  %s1085_s18 = sphi %s1126_s18, %s16_s18  }
   0x2   : > { %p191_p1 = scmp.lt.s32.totalorder %s1085_s18, 3 }
   0x4   : > { %p192_p2 = pnand %p1005_p0, %p191_p1 }
   0x5   : > { %s1006_s20 = sshll.u32 (!%p192_p2), %s1132_s19, 1  ;;  %s1087_s25 = smov (!%p192_p2), 17  }
   0x6   : > { %195 = sbr.rel (%p192_p2) target bundleno = 582 (0x246), region = 36  ;;  %p224_p3 = scmp.lt.s32.totalorder (!%p192_p2), %s1006_s20, 3 }
   0x7   : > { %s1088_s26 = smov (!%p192_p2), 16   ;;  %s1089_s27 = smov (!%p192_p2), 15  }
   0x8   : > { %s1090_s28 = smov (!%p192_p2), 1   ;;  %s1091_s29 = smov (!%p192_p2), 127  }
   0x9   : > { %s1092_s30 = smov (!%p192_p2), 113   ;;  %s1093_s6 = smov (!%p192_p2), 112  }
   0xa   : > { %s1094_s7 = smov (!%p192_p2), 111   ;;  %p235_p4 = scmp.lt.s32.totalorder (!%p192_p2), %s1132_s19, 1 }
   0xb   : > { %s1276_s20 = smov (!%p224_p3, %s1006_s20), 3  ;;  %v250_v19 = vlaneseq  ;;  %v255_v20 = vld [vmem:[%s1272_s3] sm:$0x3]  ;;  %v1155_v21 = vld [vmem:[%s1272_s3 + $0x4] sm:$0x3]  ;;  %vm292_vm1 = vcmask 1043456  }
   0xc   : > { %s1007_s21 = sshll.u32 %s1276_s20, 2  ;;  %v258_v25 = vmul.f32 %v1155_v21, %v255_v20  ;;  %v1164_v28 = vld [vmem:[%s1272_s3 + $0x6] sm:$0x3]  ;;  %vm288_vm2 = vcmask 31744   ;;  %v266_v35 = vld [vmem:[%s1270_s1] sm:$0xf] }
   0xd   : > { %s227_s24 = scalar_lea.vmem %s1269_s0, %s1007_s21  ;;  %v1157_v23 = vand.u32 127, %v250_v19  ;;  %v402_v36 = vmul.f32 %v1164_v28, %v255_v20  ;;  %v280_v38 = vperm.slane %v255_v20, 0  ;;  %v281_v39 = vperm.slane %v255_v20, 1  ;;  %v1012_v49 = vld [vmem:[%s1270_s1 + $0x4] sm:$0xf]  ;;  %s233_s17 = scalar_lea.vmem %s1273_s4, %s1007_s21 }
   0xe   : > { %v239_v0 = vld [vmem:[%s227_s24] sm:$0xff]  ;;  %v260_v26 = vperm.slane %v258_v25, 0  ;;  %v261_v27 = vperm.slane %v258_v25, 1  ;;  %v476_v52 = vperm.slane %v1155_v21, 0  ;;  %v477_v53 = vperm.slane %v1155_v21, 1  ;;  %s1278_s19 = smov (!%p235_p4, %s1132_s19), 1 }
   0xf   : > { %241 = vst [vmem:[#allocation1] ss:$2 sm:$0xff] %v239_v0  ;;  %vm252_vm0 = vcmp.lt.s32.totalorder %v1157_v23, 17  ;;  %vm397_vm3 = vcmp.lt.s32.totalorder %v1157_v23, 15  ;;  %vm276_vm4 = vcmp.lt.s32.totalorder %v1157_v23, 16  ;;  %v404_v40 = vperm.slane %v402_v36, 0 }
  0x10   : > { %v405_v41 = vperm.slane %v402_v36, 1  ;;  %vm472_vm5 = vcmp.lt.s32.totalorder %v1157_v23, 1  ;;  %v1022_v60 = vld [vmem:[%s1270_s1 + $0x8] sm:$0xf]  ;;  %v1027_v61 = vld [vmem:[%s1270_s1 + $0xc] sm:$0xf] }
  0x11   : > { %v1032_v62 = vld [vmem:[%s1270_s1 + $0x10] sm:$0xf]  ;;  %vm598_vm6 = vcmp.lt.s32.totalorder %v1157_v23, 127  ;;  %vm670_vm7 = vcmp.lt.s32.totalorder %v1157_v23, 113  ;;  %v1043_v20 = vld [vmem:[%s1270_s1 + $0x18] sm:$0xf] }
  0x12   : > { %vm745_vm8 = vcmp.lt.s32.totalorder %v1157_v23, 112  ;;  %vm817_vm9 = vcmp.lt.s32.totalorder %v1157_v23, 111  ;;  %s1010_s20 = sshll.u32 %s1278_s19, 2  ;;  %vm910_vm10 = vcmask 7168   ;;  %vm912_vm11 = vcmask 11264  }
  0x13   : > { %s238_s23 = scalar_lea.vmem %s1274_s5, %s1010_s20 }
  0x16   : > { %v242_v1 = vld.sshfl [vmem:[#allocation1] sm:$0xff pattern:$0x75316420]  ;;  %v243_v2 = vld.sshfl [vmem:[#allocation1 + $0x8] sm:$0xff pattern:$0x75316420] }
  0x17   : > { %246 = vrot.lane.b32.xlu0 %v242_v1, %s1087_s25  ;;  %267 = vst [vmem:[#allocation1] ss:$2 sm:$0xff] %v239_v0  ;;  %v602_v1 = vperm.slane %v1164_v28, 0 }
  0x1e   : > { %v268_v3 = vld.sshfl [vmem:[#allocation1] sm:$0xff pattern:$0x75316420]  ;;  %v269_v4 = vld.sshfl [vmem:[#allocation1 + $0x8] sm:$0xff pattern:$0x75316420] }
  0x1f   : > { %272 = vrot.lane.b32.xlu1 %v268_v3, %s1088_s26  ;;  %248 = vrot.lane.b32.xlu0 %v243_v2, %s1087_s25  ;;  %388 = vst [vmem:[#allocation1] ss:$2 sm:$0xff] %v239_v0  ;;  %v603_v2 = vperm.slane %v1164_v28, 1  ;;  %v1095_v3 = vmov 0  }
  0x20   : > { %1077 = vset.pattern.permute.xlu1 %v1095_v3  ;;  %1078 = vset.pattern.permute.xlu0 %v1095_v3 }
  0x26   : > { %v389_v5 = vld.sshfl [vmem:[#allocation1] sm:$0xff pattern:$0x75316420]  ;;  %v390_v6 = vld.sshfl [vmem:[#allocation1 + $0x8] sm:$0xff pattern:$0x75316420] }
  0x27   : > { %274 = vrot.lane.b32.xlu1 %v269_v4, %s1088_s26  ;;  %463 = vst [vmem:[#allocation1] ss:$2 sm:$0xff] %v239_v0  ;;  %393 = vrot.lane.b32.xlu2 %v389_v5, %s1089_s27  ;;  %v1042_v4 = vld [vmem:[%s1272_s3 + $0x2] sm:$0x3] }
  0x2e   : > { %v465_v7 = vld.sshfl [vmem:[#allocation1 + $0x8] sm:$0xff pattern:$0x75316420]  ;;  %v464_v8 = vld.sshfl [vmem:[#allocation1] sm:$0xff pattern:$0x75316420] }
  0x2f   : > { %470 = vrot.lane.b32.xlu1 %v465_v7, %s1090_s28  ;;  %468 = vrot.lane.b32.xlu0 %v464_v8, %s1090_s28  ;;  %537 = vst [vmem:[#allocation1] ss:$2 sm:$0xff] %v239_v0 }
  0x30   : > { %395 = vrot.lane.b32.xlu2 %v390_v6, %s1089_s27 }
  0x36   : > { %v1145_v9 = vld.sshfl [vmem:[#allocation1] sm:$0xff pattern:$0x75316420]  ;;  %v1147_v10 = vld.sshfl [vmem:[#allocation1 + $0x8] sm:$0xff pattern:$0x75316420] }
  0x37   : > { %589 = vst [vmem:[#allocation1] ss:$2 sm:$0xff] %v239_v0 }
  0x3e   : > { %v591_v11 = vld.sshfl [vmem:[#allocation1 + $0x8] sm:$0xff pattern:$0x75316420]  ;;  %v590_v12 = vld.sshfl [vmem:[#allocation1] sm:$0xff pattern:$0x75316420] }
  0x3f   : > { %596 = vrot.lane.b32.xlu0 %v591_v11, %s1091_s29  ;;  %661 = vst [vmem:[#allocation1] ss:$2 sm:$0xff] %v239_v0  ;;  %594 = vrot.lane.b32.xlu2 %v590_v12, %s1091_s29  ;;  %v675_v11 = vmul.f32 %v1042_v4, %v1155_v21  ;;  %v749_v21 = vperm.slane %v1042_v4, 0 }
  0x46   : > { %v662_v13 = vld.sshfl [vmem:[#allocation1] sm:$0xff pattern:$0x75316420]  ;;  %v663_v14 = vld.sshfl [vmem:[#allocation1 + $0x8] sm:$0xff pattern:$0x75316420] }
  0x47   : > { %666 = vrot.lane.b32.xlu1 %v662_v13, %s1092_s30  ;;  %736 = vst [vmem:[#allocation1] ss:$2 sm:$0xff] %v239_v0  ;;  %668 = vrot.lane.b32.xlu2 %v663_v14, %s1092_s30  ;;  %v677_v13 = vperm.slane %v675_v11, 0  ;;  %v678_v14 = vperm.slane %v675_v11, 1 }
  0x4e   : > { %v738_v15 = vld.sshfl [vmem:[#allocation1 + $0x8] sm:$0xff pattern:$0x75316420]  ;;  %v737_v16 = vld.sshfl [vmem:[#allocation1] sm:$0xff pattern:$0x75316420] }
  0x4f   : > { %743 = vrot.lane.b32.xlu1 %v738_v15, %s1093_s6  ;;  %741 = vrot.lane.b32.xlu0 %v737_v16, %s1093_s6  ;;  %808 = vst [vmem:[#allocation1] ss:$2 sm:$0xff] %v239_v0  ;;  %v881_v0 = vld [vmem:[%s1271_s2] sm:$0xf] }
  0x56   : > { %v810_v17 = vld.sshfl [vmem:[#allocation1 + $0x8] sm:$0xff pattern:$0x75316420]  ;;  %v809_v18 = vld.sshfl [vmem:[#allocation1] sm:$0xff pattern:$0x75316420] }
  0x57   : > { %815 = vrot.lane.b32.xlu0 %v810_v17, %s1094_s7  ;;  %813 = vrot.lane.b32.xlu2 %v809_v18, %s1094_s7 }
  0x58   : > { %884 = vperm.xlu1 %1077, %v881_v0  }
  0x81   : > { %v394_v24 = vpop.permute.xlu2 %393 }
  0x89   : > { %v247_v22 = vpop.permute.xlu0 %246 }
  0x8a   : > { %v396_v37 = vpop.permute.xlu2 %395 }
  0x8b   : > { %v398_v42 = vsel %vm397_vm3, %v394_v24, %v396_v37  ;;  %v399_v43 = vsel %vm397_vm3, %v396_v37, %v394_v24 }
  0x8c   : > { %v408_v50 = vmul.f32 %v404_v40, %v399_v43  ;;  %v409_v51 = vmul.f32 %v405_v41, %v398_v42 }
  0x91   : > { %v273_v29 = vpop.permute.xlu1 %272  ;;  %v249_v30 = vpop.permute.xlu0 %248 }
  0x92   : > { %v253_v31 = vsel %vm252_vm0, %v247_v22, %v249_v30  ;;  %v254_v32 = vsel %vm252_vm0, %v249_v30, %v247_v22  ;;  %v750_v22 = vperm.slane %v1042_v4, 1 }
  0x93   : > { %v264_v33 = vmul.f32 %v260_v26, %v254_v32  ;;  %v265_v34 = vmul.f32 %v261_v27, %v253_v31  ;;  %v1048_v31 = vld [vmem:[%s1270_s1 + $0x1c] sm:$0xf]  ;;  %v820_v32 = vmul.f32 %v1042_v4, %v1164_v28  ;;  %v1053_v28 = vld [vmem:[%s1270_s1 + $0x20] sm:$0xf] }
  0x95   : > { %1017 = vmatpush.msk.msra.mxu2 %vm292_vm1, %v264_v33  ;;  %1019 = vmatpush.msk.msra.mxu3 %vm292_vm1, %v265_v34  ;;  %v822_v33 = vperm.slane %v820_v32, 0  ;;  %v823_v34 = vperm.slane %v820_v32, 1 }
  0x96   : > { %1018 = vmatmul.msk.f32.vlgmr.msra.gmra.mxu2 %vm288_vm2, %v266_v35  ;;  %1020 = vmatmul.msk.f32.vlgmr.msra.gmra.mxu3 %vm288_vm2, %v266_v35 }
  0x99   : > { %v275_v44 = vpop.permute.xlu1 %274  ;;  %v595_v63 = vpop.permute.xlu2 %594 }
  0x9a   : > { %v277_v45 = vsel %vm276_vm4, %v273_v29, %v275_v44  ;;  %v278_v46 = vsel %vm276_vm4, %v275_v44, %v273_v29 }
  0x9b   : > { %v284_v47 = vmul.f32 %v280_v38, %v278_v46  ;;  %v285_v48 = vmul.f32 %v281_v39, %v277_v45 }
  0x9d   : > { %1013 = vmatpush.msk.msra.mxu0 %vm292_vm1, %v284_v47  ;;  %1015 = vmatpush.msk.msra.mxu1 %vm292_vm1, %v285_v48 }
  0x9e   : > { %1014 = vmatmul.msk.f32.vlgmr.msra.gmra.mxu0 %vm288_vm2, %v1012_v49  ;;  %1016 = vmatmul.msk.f32.vlgmr.msra.gmra.mxu1 %vm288_vm2, %v1012_v49 }
  0x9f   : > { %1023 = vmatpush.msk.msrb.mxu0 %vm292_vm1, %v408_v50  ;;  %1025 = vmatpush.msk.msrb.mxu1 %vm292_vm1, %v409_v51 }
  0xa1   : > { %1033 = vmatpush.msk.msra.mxu0 %vm292_vm1, %v1145_v9  ;;  %1035 = vmatpush.msk.msra.mxu1 %vm292_vm1, %v1147_v10  ;;  %v471_v54 = vpop.permute.xlu1 %470  ;;  %v469_v55 = vpop.permute.xlu0 %468  ;;  %v1037_v10 = vld [vmem:[%s1270_s1 + $0x14] sm:$0xf] }
  0xa2   : > { %v473_v56 = vsel %vm472_vm5, %v469_v55, %v471_v54  ;;  %v474_v57 = vsel %vm472_vm5, %v471_v54, %v469_v55  ;;  %v669_v12 = vpop.permute.xlu2 %668 }
  0xa3   : > { %v480_v58 = vmul.f32 %v476_v52, %v474_v57  ;;  %v481_v59 = vmul.f32 %v477_v53, %v473_v56 }
  0xa5   : > { %1028 = vmatpush.msk.msrb.mxu2 %vm292_vm1, %v480_v58  ;;  %1030 = vmatpush.msk.msrb.mxu3 %vm292_vm1, %v481_v59 }
  0xa6   : > { %1024 = vmatmul.msk.f32.vlgmr.msrb.gmra.mxu0 %vm288_vm2, %v1022_v60  ;;  %1026 = vmatmul.msk.f32.vlgmr.msrb.gmra.mxu1 %vm288_vm2, %v1022_v60 }
  0xa7   : > { %1029 = vmatmul.msk.f32.vlgmr.msrb.gmra.mxu2 %vm288_vm2, %v1027_v61  ;;  %1031 = vmatmul.msk.f32.vlgmr.msrb.gmra.mxu3 %vm288_vm2, %v1027_v61 }
  0xae   : > { %1034 = vmatmul.msk.f32.vlgmr.msra.gmra.mxu0 %vm288_vm2, %v1032_v62  ;;  %1036 = vmatmul.msk.f32.vlgmr.msra.gmra.mxu1 %vm288_vm2, %v1032_v62 }
  0xb1   : > { %v597_v5 = vpop.permute.xlu0 %596  ;;  %v814_v35 = vpop.permute.xlu2 %813 }
  0xb2   : > { %v599_v6 = vsel %vm598_vm6, %v595_v63, %v597_v5  ;;  %v600_v7 = vsel %vm598_vm6, %v597_v5, %v595_v63 }
  0xb3   : > { %v606_v8 = vmul.f32 %v602_v1, %v599_v6  ;;  %v607_v9 = vmul.f32 %v603_v2, %v600_v7 }
  0xb5   : > { %1038 = vmatpush.msk.msra.mxu2 %vm292_vm1, %v606_v8  ;;  %1040 = vmatpush.msk.msra.mxu3 %vm292_vm1, %v607_v9 }
  0xb6   : > { %1039 = vmatmul.msk.f32.vlgmr.msra.gmra.mxu2 %vm288_vm2, %v1037_v10  ;;  %1041 = vmatmul.msk.f32.vlgmr.msra.gmra.mxu3 %vm288_vm2, %v1037_v10 }
  0xb9   : > { %v667_v15 = vpop.permute.xlu1 %666 }
  0xba   : > { %v671_v16 = vsel %vm670_vm7, %v667_v15, %v669_v12  ;;  %v672_v17 = vsel %vm670_vm7, %v669_v12, %v667_v15 }
  0xbb   : > { %v681_v18 = vmul.f32 %v677_v13, %v671_v16  ;;  %v682_v19 = vmul.f32 %v678_v14, %v672_v17 }
  0xbd   : > { %1044 = vmatpush.msk.msrb.mxu0 %vm292_vm1, %v681_v18  ;;  %1046 = vmatpush.msk.msrb.mxu1 %vm292_vm1, %v682_v19 }
  0xbe   : > { %1045 = vmatmul.msk.f32.vlgmr.msrb.gmra.mxu0 %vm288_vm2, %v1043_v20  ;;  %1047 = vmatmul.msk.f32.vlgmr.msrb.gmra.mxu1 %vm288_vm2, %v1043_v20 }
  0xc1   : > { %v744_v24 = vpop.permute.xlu1 %743  ;;  %v742_v25 = vpop.permute.xlu0 %741 }
  0xc2   : > { %v746_v26 = vsel %vm745_vm8, %v742_v25, %v744_v24  ;;  %v747_v27 = vsel %vm745_vm8, %v744_v24, %v742_v25 }
  0xc3   : > { %v753_v29 = vmul.f32 %v749_v21, %v746_v26  ;;  %v754_v30 = vmul.f32 %v750_v22, %v747_v27 }
  0xc5   : > { %1049 = vmatpush.msk.msrb.mxu2 %vm292_vm1, %v753_v29  ;;  %1051 = vmatpush.msk.msrb.mxu3 %vm292_vm1, %v754_v30 }
  0xc6   : > { %1050 = vmatmul.msk.f32.vlgmr.msrb.gmra.mxu2 %vm288_vm2, %v1048_v31  ;;  %1052 = vmatmul.msk.f32.vlgmr.msrb.gmra.mxu3 %vm288_vm2, %v1048_v31 }
  0xc9   : > { %v816_v36 = vpop.permute.xlu0 %815 }
  0xca   : > { %v818_v37 = vsel %vm817_vm9, %v814_v35, %v816_v36  ;;  %v819_v38 = vsel %vm817_vm9, %v816_v36, %v814_v35  ;;  %v885_v6 = vpop.permute.xlu1 %884 }
  0xcb   : > { %v826_v39 = vmul.f32 %v822_v33, %v818_v37  ;;  %v827_v40 = vmul.f32 %v823_v34, %v819_v38 }
  0xcd   : > { %1054 = vmatpush.msk.msra.mxu0 %vm292_vm1, %v826_v39  ;;  %1056 = vmatpush.msk.msra.mxu1 %vm292_vm1, %v827_v40 }
  0xce   : > { %1055 = vmatmul.msk.f32.vlgmr.msra.gmra.mxu0 %vm288_vm2, %v1053_v28  ;;  %1057 = vmatmul.msk.f32.vlgmr.msra.gmra.mxu1 %vm288_vm2, %v1053_v28 }
 0x119   : > { %v365_v42 = vpop.f32.mrf.mxu2  ;;  %v385_v43 = vpop.f32.mrf.mxu3 }
 0x11b   : > { %v316_v23 = vpop.f32.mrf.mxu0  ;;  %v336_v41 = vpop.f32.mrf.mxu1 }
 0x11c   : > { %v366_v46 = vadd.f32 %v365_v42, %v316_v23  ;;  %v386_v47 = vadd.f32 %v385_v43, %v336_v41 }
 0x123   : > { %v438_v44 = vpop.f32.mrf.mxu0  ;;  %v458_v45 = vpop.f32.mrf.mxu1 }
 0x124   : > { %v461_v50 = vadd.f32 %v438_v44, %v366_v46  ;;  %v462_v51 = vadd.f32 %v458_v45, %v386_v47 }
 0x12a   : > { %v510_v48 = vpop.f32.mrf.mxu2  ;;  %v530_v49 = vpop.f32.mrf.mxu3 }
 0x12b   : > { %v564_v52 = vpop.f32.mrf.mxu0  ;;  %v584_v53 = vpop.f32.mrf.mxu1  ;;  %v533_v54 = vadd.f32 %v510_v48, %v461_v50  ;;  %v534_v55 = vadd.f32 %v530_v49, %v462_v51 }
 0x12d   : > { %v587_v58 = vadd.f32 %v564_v52, %v533_v54  ;;  %v588_v59 = vadd.f32 %v584_v53, %v534_v55 }
 0x139   : > { %v636_v56 = vpop.f32.mrf.mxu2  ;;  %v656_v57 = vpop.f32.mrf.mxu3 }
 0x13a   : > { %v659_v62 = vadd.f32 %v636_v56, %v587_v58  ;;  %v660_v63 = vadd.f32 %v656_v57, %v588_v59 }
 0x13b   : > { %v711_v60 = vpop.f32.mrf.mxu0  ;;  %v731_v61 = vpop.f32.mrf.mxu1 }
 0x13c   : > { %v734_v0 = vadd.f32 %v711_v60, %v659_v62  ;;  %v735_v1 = vadd.f32 %v731_v61, %v660_v63 }
 0x149   : > { %v783_v2 = vpop.f32.mrf.mxu2  ;;  %v803_v3 = vpop.f32.mrf.mxu3 }
 0x14a   : > { %v806_v4 = vadd.f32 %v783_v2, %v734_v0  ;;  %v807_v5 = vadd.f32 %v803_v3, %v735_v1 }
 0x14b   : > { %v856_v7 = vpop.f32.mrf.mxu0  ;;  %v876_v8 = vpop.f32.mrf.mxu1 }
 0x14c   : > { %v879_v9 = vadd.f32 %v856_v7, %v806_v4  ;;  %v880_v10 = vadd.f32 %v876_v8, %v807_v5 }
 0x14e   : > { %v887_v11 = vadd.f32 %v885_v6, %v879_v9  ;;  %v888_v12 = vadd.f32 %v885_v6, %v880_v10 }
 0x150   : > { %v891_v13 = vrot.slane %v888_v12, 4  ;;  %v895_v14 = vsel %vm292_vm1, %v887_v11, 0.0  ;;  %v896_v15 = vsel %vm292_vm1, %v888_v12, 0.0 }
 0x151   : > { %v897_v16 = vadd.f32 %v896_v15, %v895_v14 }
 0x152   : > { %v892_v17 = vsel %vm292_vm1, %v887_v11, %v891_v13 }
 0x153   : > { %894 = vst [vmem:[%s233_s17] sm:$0xff] %v892_v17  ;;  %898 = vadd.xlane.f32.xlu2 %v897_v16 }
 0x1c6   : > { %v899_v18 = vpop.xlane.xlu2 %898 }
 0x1c7   : > { %v900_v19 = vmul.f32 0.00390625, %v899_v18 }
 0x1c9   : > { %v901_v20 = vsub.f32 %v887_v11, %v900_v19  ;;  %v902_v21 = vsub.f32 %v888_v12, %v900_v19 }
 0x1cb   : > { %v903_v22 = vmul.f32 %v901_v20, %v901_v20  ;;  %v904_v24 = vmul.f32 %v902_v21, %v902_v21 }
 0x1cd   : > { %v905_v25 = vsel %vm292_vm1, %v903_v22, 0.0  ;;  %v906_v26 = vsel %vm292_vm1, %v904_v24, 0.0 }
 0x1ce   : > { %v907_v27 = vadd.f32 %v906_v26, %v905_v25 }
 0x1d0   : > { %908 = vadd.xlane.f32.xlu0 %v907_v27 }
 0x243   : > { %v909_v29 = vpop.xlane.xlu0 %908 }
 0x244   : > { %v911_v30 = vsel %vm910_vm10, %v900_v19, %v909_v29 }
 0x245   : > { %913 = vst.msk [vmem:[%s238_s23] sm:$0xf] %vm912_vm11, %v911_v30 }
 0x246 PF: > { %s16_s18 = sadd.s32 1, %s1085_s18  }
 0x247   : > { %p13_p5 = scmp.ge.s32.totalorder %s16_s18, 4  }
 0x249   :  { %15 = sbr.rel (!%p13_p5) target bundleno = 1 (0x1), region = 89 }

// kernel: encoder_forward.4
= control target key start
LH: loop header
LB: loop body
LE: loop exit
PB: predicated region body
PF: predicated region fallthrough
CT: control target
= control target key end

     0   :  { %s1243_s24 = smov 0   ;;  %s1375_s0 = inlined_call_operand.vmem [shape: f32[4,512], index: 0, kind: input, shape index: {}]   ;;  %s1376_s1 = inlined_call_operand.vmem [shape: f32[4,512], index: 1, kind: input, shape index: {}]   ;;  %s1377_s2 = inlined_call_operand.vmem [shape: f32[9,4,4], index: 2, kind: input, shape index: {}]   ;;  %s1378_s3 = inlined_call_operand.vmem [shape: f32[4,1], index: 3, kind: input, shape index: {}]   ;;  %s1379_s4 = inlined_call_operand.vmem [shape: f32[4,1], index: 4, kind: input, shape index: {}]   ;;  %s1380_s5 = inlined_call_operand.vmem [shape: f32[4,1], index: 5, kind: input, shape index: {}]   ;;  %s1381_s6 = inlined_call_operand.vmem [shape: f32[4,1,256], index: 6, kind: input, shape index: {}]   ;;  %s1382_s7 = inlined_call_operand.vmem [shape: f32[4,512], index: 7, kind: output, shape index: {}]  }
   0x1 LB: > { %s1103_s25 = sadd.s32 4294967295, %s1191_s24   ;;  %p1107_p0 = scmp.ge.s32.totalorder %s1191_s24, 1  ;;  %s1191_s24 = sphi %s1243_s24, %s17_s24  }
   0x2   : > { %p249_p1 = scmp.lt.s32.totalorder %s1191_s24, 3 }
   0x4   : > { %p250_p2 = pnand %p1107_p0, %p249_p1 }
   0x5   : > { %s1108_s30 = sshll.u32 (!%p250_p2), %s1103_s25, 1  ;;  %s1195_s12 = smov (!%p250_p2), 17  }
   0x6   : > { %253 = sbr.rel (%p250_p2) target bundleno = 519 (0x207), region = 48  ;;  %p287_p3 = scmp.lt.s32.totalorder (!%p250_p2), %s1108_s30, 3 }
   0x7   : > { %s1196_s13 = smov (!%p250_p2), 16   ;;  %s1197_s14 = smov (!%p250_p2), 15  }
   0x8   : > { %s1198_s15 = smov (!%p250_p2), 1   ;;  %s1199_s16 = smov (!%p250_p2), 127  }
   0x9   : > { %s1200_s17 = smov (!%p250_p2), 113   ;;  %s1201_s18 = smov (!%p250_p2), 112  }
   0xa   : > { %s1202_s25 = smov (!%p250_p2), 111  }
   0xb   : > { %v305_v0 = vld [vmem:[%s1379_s4] sm:$0xf]  ;;  %v1193_v1 = vmov 0   ;;  %s1384_s30 = smov (!%p287_p3, %s1108_s30), 3  ;;  %v1194_v3 = vmov 839922192  }
   0xc   : > { %1182 = vset.pattern.permute.xlu0 %v1193_v1  ;;  %v316_v2 = vld [vmem:[%s1380_s5] sm:$0xf]  ;;  %v311_v4 = vunpack.c.l.s4 %v1194_v3  ;;  %s1257_s8 = sshll.u32 %s1384_s30, 2  ;;  %vm423_vm5 = vcmask 1043456   ;;  %vm419_vm6 = vcmask 31744  }
   0xd   : > { %308 = vperm.xlu0 %1182, %v305_v0   ;;  %s290_s11 = scalar_lea.vmem %s1375_s0, %s1257_s8  ;;  %s296_s21 = scalar_lea.vmem %s1376_s1, %s1257_s8 }
   0xe   : > { %v312_v6 = vunpack.c.0.s8 %v311_v4  ;;  %v304_v8 = vld [vmem:[%s290_s11] sm:$0xff]  ;;  %s302_s11 = scalar_lea.vmem %s1382_s7, %s1257_s8 }
   0xf   : > { %v1020_v4 = vld [vmem:[%s296_s21] sm:$0xff] }
  0x15   : > { %319 = vperm.xlu0 %1182, %v316_v2  }
  0x7f   : > { %v309_v5 = vpop.permute.xlu0 %308 }
  0x80   : > { %v313_v7 = vperm.slane %v309_v5, %v312_v6  ;;  %v1012_v5 = vld [vmem:[%s1378_s3] sm:$0xf] }
  0x82   : > { %v315_v10 = vmul.f32 %v313_v7, %v304_v8  ;;  %v381_v8 = vlaneseq }
  0x87   : > { %v320_v9 = vpop.permute.xlu0 %319 }
  0x88   : > { %v324_v11 = vperm.slane %v320_v9, %v312_v6 }
  0x8a   : > { %v326_v12 = vadd.f32 %v324_v11, %v315_v10  ;;  %v1274_v10 = vand.u32 127, %v381_v8  ;;  %v386_v11 = vld [vmem:[%s1381_s6] sm:$0x3] }
  0x8c   : > { %v328_v13 = vmul.f32 0.70710677, %v326_v12  ;;  %v327_v49 = vmul.f32 0.5, %v326_v12  ;;  %vm407_vm4 = vcmp.lt.s32.totalorder %v1274_v10, 16  ;;  %v411_v12 = vperm.slane %v386_v11, 0 }
  0x8d   : > { %vm383_vm7 = vcmp.lt.s32.totalorder %v1274_v10, 17  ;;  %vm528_vm8 = vcmp.lt.s32.totalorder %v1274_v10, 15  ;;  %vm603_vm9 = vcmp.lt.s32.totalorder %v1274_v10, 1  ;;  %vm729_vm10 = vcmp.lt.s32.totalorder %v1274_v10, 127 }
  0x8e   : > { %v329_v14 = vmul.f32 %v328_v13, %v328_v13  ;;  %vm801_vm11 = vcmp.lt.s32.totalorder %v1274_v10, 113  ;;  %vm876_vm12 = vcmp.lt.s32.totalorder %v1274_v10, 112  ;;  %vm948_vm13 = vcmp.lt.s32.totalorder %v1274_v10, 111 }
  0x90   : > { %v330_v15 = vmin.f32 %v329_v14, 16.0 }
  0x92   : > { %v331_v16 = vmul.f32 2.1237322e-06, %v330_v15  ;;  %v342_v17 = vmul.f32 3.8918573e-05, %v330_v15 }
  0x94   : > { %v332_v18 = vadd.f32 0.00028619796, %v331_v16  ;;  %v343_v19 = vadd.f32 0.001143296, %v342_v17 }
  0x96   : > { %v333_v20 = vmul.f32 %v332_v18, %v330_v15  ;;  %v344_v21 = vmul.f32 %v343_v19, %v330_v15  ;;  %v1116_v19 = vld [vmem:[%s1377_s2 + $0x4] sm:$0xf] }
  0x98   : > { %v345_v22 = vadd.f32 0.014752088, %v344_v21  ;;  %v334_v23 = vadd.f32 0.0036580483, %v333_v20  ;;  %v1115_v20 = vld [vmem:[%s1381_s6 + $0x4] sm:$0x3] }
  0x9a   : > { %v346_v24 = vmul.f32 %v345_v22, %v330_v15  ;;  %v335_v26 = vmul.f32 %v334_v23, %v330_v15  ;;  %v389_v22 = vmul.f32 %v1115_v20, %v386_v11 }
  0x9c   : > { %v347_v25 = vadd.f32 0.112945676, %v346_v24  ;;  %v336_v29 = vadd.f32 0.05243302, %v335_v26  ;;  %v391_v23 = vperm.slane %v389_v22, 0  ;;  %v392_v24 = vperm.slane %v389_v22, 1 }
  0x9d   : > { %v1294_v26 = vld [vmem:[%s1381_s6 + $0x6] sm:$0x3] }
  0x9e   : > { %v348_v27 = vmul.f32 %v347_v25, %v330_v15  ;;  %v337_v32 = vmul.f32 %v336_v29, %v330_v15 }
  0xa0   : > { %v349_v28 = vadd.f32 0.4994258, %v348_v27  ;;  %v338_v33 = vadd.f32 0.18741608, %v337_v32  ;;  %v533_v32 = vmul.f32 %v1294_v26, %v386_v11 }
  0xa2   : > { %v350_v30 = vmul.f32 %v349_v28, %v330_v15  ;;  %v339_v35 = vmul.f32 %v338_v33, %v330_v15  ;;  %v535_v33 = vperm.slane %v533_v32, 0 }
  0xa4   : > { %v351_v31 = vadd.f32 1.0, %v350_v30  ;;  %v340_v39 = vadd.f32 1.1283791, %v339_v35 }
  0xa6   : > { %1183 = vrcp.f32 %v351_v31  ;;  %v363_v38 = vand.u32 2147483648, %v351_v31  ;;  %v361_v41 = vand.u32 2147483647, %v351_v31  ;;  %vm357_vm1 = vweird.f32 %v351_v31 }
  0xa7   : > { %v341_v44 = vmul.f32 %v340_v39, %v328_v13  ;;  %v412_v13 = vperm.slane %v386_v11, 1 }
  0xa8   : > { %v364_v43 = vor.u32 1.1754944e-38, %v363_v38  ;;  %vm362_vm3 = vcmp.eq.f32.partialorder %v361_v41, 8.507059e+37  ;;  %v1126_v41 = vld [vmem:[%s1377_s2 + $0x8] sm:$0xf] }
  0xac   : > { %v1184_v34 = vpop.eup %1183 }
  0xad   : > { %v353_v36 = vmul.f32 %v1184_v34, %v351_v31  ;;  %vm358_vm0 = vweird.f32 %v1184_v34  ;;  %v397_v31 = vld [vmem:[%s1377_s2] sm:$0xf] }
  0xae   : > { %vm359_vm2 = vmor %vm357_vm1, %vm358_vm0 }
  0xaf   : > { %v354_v37 = vsub.f32 1.0, %v353_v36 }
  0xb1   : > { %v355_v40 = vmul.f32 %v1184_v34, %v354_v37 }
  0xb3   : > { %v356_v42 = vadd.f32 %v1184_v34, %v355_v40 }
  0xb5   : > { %v360_v45 = vsel %vm359_vm2, %v1184_v34, %v356_v42  ;;  %v536_v34 = vperm.slane %v533_v32, 1  ;;  %v607_v42 = vperm.slane %v1115_v20, 0 }
  0xb6   : > { %v365_v46 = vsel %vm362_vm3, %v364_v43, %v360_v45  ;;  %v608_v43 = vperm.slane %v1115_v20, 1 }
  0xb7   : > { %v366_v47 = vmul.f32 %v365_v46, %v341_v44 }
  0xb9   : > { %v1114_v48 = vclamps-f32 %v366_v47, 1.0 }
  0xbb   : > { %v369_v50 = vadd.f32 1.0, %v1114_v48 }
  0xbd   : > { %v370_v51 = vmul.f32 %v369_v50, %v327_v49  ;;  %v1131_v50 = vld [vmem:[%s1377_s2 + $0xc] sm:$0xf] }
  0xbf   : > { %372 = vst [vmem:[#allocation1] ss:$2 sm:$0xff] %v370_v51 }
  0xc6   : > { %v373_v52 = vld.sshfl [vmem:[#allocation1] sm:$0xff pattern:$0x75316420]  ;;  %v374_v53 = vld.sshfl [vmem:[#allocation1 + $0x8] sm:$0xff pattern:$0x75316420] }
  0xc7   : > { %377 = vrot.lane.b32.xlu1 %v373_v52, %s1195_s12  ;;  %398 = vst [vmem:[#allocation1] ss:$2 sm:$0xff] %v370_v51  ;;  %v733_v52 = vperm.slane %v1294_v26, 0 }
  0xce   : > { %v399_v54 = vld.sshfl [vmem:[#allocation1] sm:$0xff pattern:$0x75316420]  ;;  %v400_v55 = vld.sshfl [vmem:[#allocation1 + $0x8] sm:$0xff pattern:$0x75316420] }
  0xcf   : > { %379 = vrot.lane.b32.xlu1 %v374_v53, %s1195_s12  ;;  %403 = vrot.lane.b32.xlu2 %v399_v54, %s1196_s13  ;;  %519 = vst [vmem:[#allocation1] ss:$2 sm:$0xff] %v370_v51  ;;  %v734_v53 = vperm.slane %v1294_v26, 1  ;;  %v1146_v54 = vld [vmem:[%s1381_s6 + $0x2] sm:$0x3] }
  0xd0   : > { %v880_v8 = vperm.slane %v1146_v54, 0 }
  0xd6   : > { %v521_v56 = vld.sshfl [vmem:[#allocation1 + $0x8] sm:$0xff pattern:$0x75316420]  ;;  %v520_v57 = vld.sshfl [vmem:[#allocation1] sm:$0xff pattern:$0x75316420] }
  0xd7   : > { %405 = vrot.lane.b32.xlu2 %v400_v55, %s1196_s13  ;;  %526 = vrot.lane.b32.xlu1 %v521_v56, %s1197_s14  ;;  %594 = vst [vmem:[#allocation1] ss:$2 sm:$0xff] %v370_v51 }
  0xd8   : > { %524 = vrot.lane.b32.xlu0 %v520_v57, %s1197_s14 }
  0xde   : > { %v596_v58 = vld.sshfl [vmem:[#allocation1 + $0x8] sm:$0xff pattern:$0x75316420]  ;;  %v595_v59 = vld.sshfl [vmem:[#allocation1] sm:$0xff pattern:$0x75316420] }
  0xdf   : > { %599 = vrot.lane.b32.xlu2 %v595_v59, %s1198_s15  ;;  %668 = vst [vmem:[#allocation1] ss:$2 sm:$0xff] %v370_v51 }
  0xe0   : > { %601 = vrot.lane.b32.xlu0 %v596_v58, %s1198_s15 }
  0xe6   : > { %v1263_v60 = vld.sshfl [vmem:[#allocation1] sm:$0xff pattern:$0x75316420]  ;;  %v1265_v61 = vld.sshfl [vmem:[#allocation1 + $0x8] sm:$0xff pattern:$0x75316420] }
  0xe7   : > { %720 = vst [vmem:[#allocation1] ss:$2 sm:$0xff] %v370_v51 }
  0xee   : > { %v722_v62 = vld.sshfl [vmem:[#allocation1 + $0x8] sm:$0xff pattern:$0x75316420]  ;;  %v721_v63 = vld.sshfl [vmem:[#allocation1] sm:$0xff pattern:$0x75316420] }
  0xef   : > { %727 = vrot.lane.b32.xlu2 %v722_v62, %s1199_s16  ;;  %725 = vrot.lane.b32.xlu1 %v721_v63, %s1199_s16  ;;  %792 = vst [vmem:[#allocation1] ss:$2 sm:$0xff] %v370_v51  ;;  %v806_v62 = vmul.f32 %v1146_v54, %v1115_v20 }
  0xf1   : > { %v808_v63 = vperm.slane %v806_v62, 0 }
  0xf6   : > { %v794_v0 = vld.sshfl [vmem:[#allocation1 + $0x8] sm:$0xff pattern:$0x75316420]  ;;  %v793_v1 = vld.sshfl [vmem:[#allocation1] sm:$0xff pattern:$0x75316420] }
  0xf7   : > { %799 = vrot.lane.b32.xlu1 %v794_v0, %s1200_s17  ;;  %797 = vrot.lane.b32.xlu0 %v793_v1, %s1200_s17  ;;  %867 = vst [vmem:[#allocation1] ss:$2 sm:$0xff] %v370_v51  ;;  %v809_v0 = vperm.slane %v806_v62, 1 }
  0xfe   : > { %v869_v2 = vld.sshfl [vmem:[#allocation1 + $0x8] sm:$0xff pattern:$0x75316420]  ;;  %v868_v3 = vld.sshfl [vmem:[#allocation1] sm:$0xff pattern:$0x75316420] }
  0xff   : > { %874 = vrot.lane.b32.xlu0 %v869_v2, %s1201_s18  ;;  %872 = vrot.lane.b32.xlu2 %v868_v3, %s1201_s18  ;;  %939 = vst [vmem:[#allocation1] ss:$2 sm:$0xff] %v370_v51  ;;  %v1136_v51 = vld [vmem:[%s1377_s2 + $0x10] sm:$0xf] }
 0x106   : > { %v941_v6 = vld.sshfl [vmem:[#allocation1 + $0x8] sm:$0xff pattern:$0x75316420]  ;;  %v940_v7 = vld.sshfl [vmem:[#allocation1] sm:$0xff pattern:$0x75316420] }
 0x107   : > { %1015 = vperm.xlu0 %1182, %v1012_v5   ;;  %946 = vrot.lane.b32.xlu2 %v941_v6, %s1202_s25  ;;  %1022 = vst [vmem:[#allocation1] ss:$2 sm:$0xff] %v1020_v4 }
 0x108   : > { %944 = vrot.lane.b32.xlu1 %v940_v7, %s1202_s25  ;;  %v1147_v7 = vld [vmem:[%s1377_s2 + $0x18] sm:$0xf] }
 0x10e   : > { %v1024_v62 = vld.sshfl [vmem:[#allocation1 + $0x8] sm:$0xff pattern:$0x75316420] }
 0x129   : > { %v404_v9 = vpop.permute.xlu2 %403 }
 0x131   : > { %v406_v14 = vpop.permute.xlu2 %405 }
 0x132   : > { %v408_v15 = vsel %vm407_vm4, %v404_v9, %v406_v14  ;;  %v409_v16 = vsel %vm407_vm4, %v406_v14, %v404_v9  ;;  %v881_v9 = vperm.slane %v1146_v54, 1 }
 0x133   : > { %v415_v17 = vmul.f32 %v411_v12, %v409_v16  ;;  %v416_v18 = vmul.f32 %v412_v13, %v408_v15 }
 0x135   : > { %1117 = vmatpush.msk.msra.mxu0 %vm423_vm5, %v415_v17  ;;  %1119 = vmatpush.msk.msra.mxu1 %vm423_vm5, %v416_v18  ;;  %v1152_v17 = vld [vmem:[%s1377_s2 + $0x1c] sm:$0xf]  ;;  %v951_v18 = vmul.f32 %v1146_v54, %v1294_v26  ;;  %v1157_v26 = vld [vmem:[%s1377_s2 + $0x20] sm:$0xf] }
 0x136   : > { %1118 = vmatmul.msk.f32.vlgmr.msra.gmra.mxu0 %vm419_vm6, %v1116_v19  ;;  %1120 = vmatmul.msk.f32.vlgmr.msra.gmra.mxu1 %vm419_vm6, %v1116_v19 }
 0x137   : > { %v953_v19 = vperm.slane %v951_v18, 0  ;;  %v954_v20 = vperm.slane %v951_v18, 1 }
 0x139   : > { %v378_v21 = vpop.permute.xlu1 %377  ;;  %v600_v44 = vpop.permute.xlu2 %599 }
 0x141   : > { %v380_v25 = vpop.permute.xlu1 %379 }
 0x142   : > { %v384_v27 = vsel %vm383_vm7, %v378_v21, %v380_v25  ;;  %v385_v28 = vsel %vm383_vm7, %v380_v25, %v378_v21 }
 0x143   : > { %v395_v29 = vmul.f32 %v391_v23, %v385_v28  ;;  %v396_v30 = vmul.f32 %v392_v24, %v384_v27 }
 0x145   : > { %1121 = vmatpush.msk.msra.mxu2 %vm423_vm5, %v395_v29  ;;  %1123 = vmatpush.msk.msra.mxu3 %vm423_vm5, %v396_v30 }
 0x146   : > { %1124 = vmatmul.msk.f32.vlgmr.msra.gmra.mxu3 %vm419_vm6, %v397_v31  ;;  %1122 = vmatmul.msk.f32.vlgmr.msra.gmra.mxu2 %vm419_vm6, %v397_v31 }
 0x149   : > { %v527_v35 = vpop.permute.xlu1 %526  ;;  %v728_v55 = vpop.permute.xlu2 %727 }
 0x14a   : > { %v525_v36 = vpop.permute.xlu0 %524 }
 0x14b   : > { %v529_v37 = vsel %vm528_vm8, %v525_v36, %v527_v35  ;;  %v530_v38 = vsel %vm528_vm8, %v527_v35, %v525_v36 }
 0x14c   : > { %v539_v39 = vmul.f32 %v535_v33, %v530_v38  ;;  %v540_v40 = vmul.f32 %v536_v34, %v529_v37 }
 0x14e   : > { %1127 = vmatpush.msk.msrb.mxu0 %vm423_vm5, %v539_v39  ;;  %1129 = vmatpush.msk.msrb.mxu1 %vm423_vm5, %v540_v40 }
 0x14f   : > { %1130 = vmatmul.msk.f32.vlgmr.msrb.gmra.mxu1 %vm419_vm6, %v1126_v41  ;;  %1128 = vmatmul.msk.f32.vlgmr.msrb.gmra.mxu0 %vm419_vm6, %v1126_v41 }
 0x150   : > { %1137 = vmatpush.msk.msra.mxu0 %vm423_vm5, %v1263_v60  ;;  %1139 = vmatpush.msk.msra.mxu1 %vm423_vm5, %v1265_v61  ;;  %v1141_v61 = vld [vmem:[%s1377_s2 + $0x14] sm:$0xf] }
 0x152   : > { %v602_v45 = vpop.permute.xlu0 %601 }
 0x153   : > { %v604_v46 = vsel %vm603_vm9, %v600_v44, %v602_v45  ;;  %v605_v47 = vsel %vm603_vm9, %v602_v45, %v600_v44 }
 0x154   : > { %v611_v48 = vmul.f32 %v607_v42, %v605_v47  ;;  %v612_v49 = vmul.f32 %v608_v43, %v604_v46 }
 0x156   : > { %1132 = vmatpush.msk.msrb.mxu2 %vm423_vm5, %v611_v48  ;;  %1134 = vmatpush.msk.msrb.mxu3 %vm423_vm5, %v612_v49 }
 0x157   : > { %1135 = vmatmul.msk.f32.vlgmr.msrb.gmra.mxu3 %vm419_vm6, %v1131_v50  ;;  %1133 = vmatmul.msk.f32.vlgmr.msrb.gmra.mxu2 %vm419_vm6, %v1131_v50 }
 0x158   : > { %1140 = vmatmul.msk.f32.vlgmr.msra.gmra.mxu1 %vm419_vm6, %v1136_v51  ;;  %1138 = vmatmul.msk.f32.vlgmr.msra.gmra.mxu0 %vm419_vm6, %v1136_v51 }
 0x159   : > { %v873_v11 = vpop.permute.xlu2 %872 }
 0x161   : > { %v726_v56 = vpop.permute.xlu1 %725  ;;  %v947_v21 = vpop.permute.xlu2 %946 }
 0x162   : > { %v730_v57 = vsel %vm729_vm10, %v726_v56, %v728_v55  ;;  %v731_v58 = vsel %vm729_vm10, %v728_v55, %v726_v56 }
 0x163   : > { %v737_v59 = vmul.f32 %v733_v52, %v730_v57  ;;  %v738_v60 = vmul.f32 %v734_v53, %v731_v58 }
 0x165   : > { %1142 = vmatpush.msk.msra.mxu2 %vm423_vm5, %v737_v59  ;;  %1144 = vmatpush.msk.msra.mxu3 %vm423_vm5, %v738_v60 }
 0x166   : > { %1145 = vmatmul.msk.f32.vlgmr.msra.gmra.mxu3 %vm419_vm6, %v1141_v61  ;;  %1143 = vmatmul.msk.f32.vlgmr.msra.gmra.mxu2 %vm419_vm6, %v1141_v61 }
 0x169   : > { %v800_v1 = vpop.permute.xlu1 %799  ;;  %v798_v2 = vpop.permute.xlu0 %797 }
 0x16a   : > { %v802_v3 = vsel %vm801_vm11, %v798_v2, %v800_v1  ;;  %v803_v4 = vsel %vm801_vm11, %v800_v1, %v798_v2  ;;  %v1023_v1 = vld.sshfl [vmem:[#allocation1] sm:$0xff pattern:$0x75316420] }
 0x16b   : > { %v812_v5 = vmul.f32 %v808_v63, %v802_v3  ;;  %v813_v6 = vmul.f32 %v809_v0, %v803_v4 }
 0x16d   : > { %1148 = vmatpush.msk.msrb.mxu0 %vm423_vm5, %v812_v5  ;;  %1150 = vmatpush.msk.msrb.mxu1 %vm423_vm5, %v813_v6 }
 0x16e   : > { %1151 = vmatmul.msk.f32.vlgmr.msrb.gmra.mxu1 %vm419_vm6, %v1147_v7  ;;  %1149 = vmatmul.msk.f32.vlgmr.msrb.gmra.mxu0 %vm419_vm6, %v1147_v7 }
 0x171   : > { %v875_v12 = vpop.permute.xlu0 %874 }
 0x172   : > { %v877_v13 = vsel %vm876_vm12, %v873_v11, %v875_v12  ;;  %v878_v14 = vsel %vm876_vm12, %v875_v12, %v873_v11 }
 0x173   : > { %v884_v15 = vmul.f32 %v880_v8, %v877_v13  ;;  %v885_v16 = vmul.f32 %v881_v9, %v878_v14 }
 0x175   : > { %1153 = vmatpush.msk.msrb.mxu2 %vm423_vm5, %v884_v15  ;;  %1155 = vmatpush.msk.msrb.mxu3 %vm423_vm5, %v885_v16 }
 0x176   : > { %1154 = vmatmul.msk.f32.vlgmr.msrb.gmra.mxu2 %vm419_vm6, %v1152_v17  ;;  %1156 = vmatmul.msk.f32.vlgmr.msrb.gmra.mxu3 %vm419_vm6, %v1152_v17 }
 0x179   : > { %v1016_v61 = vpop.permute.xlu0 %1015 }
 0x17a   : > { %v945_v22 = vpop.permute.xlu1 %944 }
 0x17b   : > { %v949_v23 = vsel %vm948_vm13, %v945_v22, %v947_v21  ;;  %v950_v24 = vsel %vm948_vm13, %v947_v21, %v945_v22 }
 0x17c   : > { %v957_v25 = vmul.f32 %v953_v19, %v949_v23  ;;  %v958_v27 = vmul.f32 %v954_v20, %v950_v24 }
 0x17e   : > { %1158 = vmatpush.msk.msra.mxu0 %vm423_vm5, %v957_v25  ;;  %1160 = vmatpush.msk.msra.mxu1 %vm423_vm5, %v958_v27 }
 0x17f   : > { %1159 = vmatmul.msk.f32.vlgmr.msra.gmra.mxu0 %vm419_vm6, %v1157_v26  ;;  %1161 = vmatmul.msk.f32.vlgmr.msra.gmra.mxu1 %vm419_vm6, %v1157_v26 }
 0x1b3   : > { %v447_v10 = vpop.f32.mrf.mxu0  ;;  %v467_v28 = vpop.f32.mrf.mxu1 }
 0x1c9   : > { %v496_v29 = vpop.f32.mrf.mxu2  ;;  %v516_v30 = vpop.f32.mrf.mxu3 }
 0x1ca   : > { %v517_v33 = vadd.f32 %v516_v30, %v467_v28  ;;  %v497_v34 = vadd.f32 %v496_v29, %v447_v10 }
 0x1cc   : > { %v569_v31 = vpop.f32.mrf.mxu0  ;;  %v589_v32 = vpop.f32.mrf.mxu1 }
 0x1cd   : > { %v593_v37 = vadd.f32 %v589_v32, %v517_v33  ;;  %v592_v38 = vadd.f32 %v569_v31, %v497_v34 }
 0x1d5   : > { %v695_v39 = vpop.f32.mrf.mxu0  ;;  %v715_v40 = vpop.f32.mrf.mxu1 }
 0x1da   : > { %v641_v35 = vpop.f32.mrf.mxu2  ;;  %v661_v36 = vpop.f32.mrf.mxu3 }
 0x1db   : > { %v665_v41 = vadd.f32 %v661_v36, %v593_v37  ;;  %v664_v42 = vadd.f32 %v641_v35, %v592_v38 }
 0x1dd   : > { %v719_v45 = vadd.f32 %v715_v40, %v665_v41  ;;  %v718_v46 = vadd.f32 %v695_v39, %v664_v42 }
 0x1e9   : > { %v787_v43 = vpop.f32.mrf.mxu3  ;;  %v767_v44 = vpop.f32.mrf.mxu2 }
 0x1ea   : > { %v791_v47 = vadd.f32 %v787_v43, %v719_v45  ;;  %v790_v48 = vadd.f32 %v767_v44, %v718_v46 }
 0x1eb   : > { %v862_v49 = vpop.f32.mrf.mxu1  ;;  %v842_v50 = vpop.f32.mrf.mxu0 }
 0x1ec   : > { %v866_v51 = vadd.f32 %v862_v49, %v791_v47  ;;  %v865_v52 = vadd.f32 %v842_v50, %v790_v48 }
 0x1f9   : > { %v914_v53 = vpop.f32.mrf.mxu2  ;;  %v934_v54 = vpop.f32.mrf.mxu3 }
 0x1fa   : > { %v937_v55 = vadd.f32 %v914_v53, %v865_v52  ;;  %v938_v56 = vadd.f32 %v934_v54, %v866_v51 }
 0x1fc   : > { %v987_v57 = vpop.f32.mrf.mxu0  ;;  %v1007_v58 = vpop.f32.mrf.mxu1 }
 0x1fd   : > { %v1010_v59 = vadd.f32 %v987_v57, %v937_v55  ;;  %v1011_v60 = vadd.f32 %v1007_v58, %v938_v56 }
 0x1ff   : > { %v1018_v63 = vadd.f32 %v1016_v61, %v1010_v59  ;;  %v1019_v0 = vadd.f32 %v1016_v61, %v1011_v60 }
 0x201   : > { %v1028_v2 = vadd.f32 %v1024_v62, %v1019_v0  ;;  %v1027_v3 = vadd.f32 %v1023_v1, %v1018_v63 }
 0x203   : > { %v1031_v4 = vrot.slane %v1028_v2, 4 }
 0x205   : > { %v1032_v5 = vsel %vm423_vm5, %v1027_v3, %v1031_v4 }
 0x206   : > { %1034 = vst [vmem:[%s302_s11] sm:$0xff] %v1032_v5 }
 0x207 PF: > { %s17_s24 = sadd.s32 1, %s1191_s24  }
 0x208   : > { %p14_p4 = scmp.ge.s32.totalorder %s17_s24, 4  }
 0x20a   :  { %16 = sbr.rel (!%p14_p4) target bundleno = 1 (0x1), region = 92 }

// kernel: encoder_forward.5
= control target key start
LH: loop header
LB: loop body
LE: loop exit
PB: predicated region body
PF: predicated region fallthrough
CT: control target
= control target key end

     0   :  { %v152_v2 = vmov 0   ;;  %vm35_vm0 = vcmask 523264   ;;  %vm114_vm5 = vcmask 1043456   ;;  %vm110_vm6 = vcmask 31744   ;;  %s222_s0 = inlined_call_operand.vmem [shape: f32[64,32], index: 0, kind: input, shape index: {}]   ;;  %s223_s2 = inlined_call_operand.vmem [shape: f32[4,1], index: 2, kind: input, shape index: {}]   ;;  %s224_s4 = inlined_call_operand.vmem [shape: f32[4,1], index: 4, kind: input, shape index: {}]   ;;  %s225_s1 = inlined_call_operand.vmem [shape: f32[4,64], index: 1, kind: input, shape index: {}]   ;;  %s226_s3 = inlined_call_operand.vmem [shape: f32[4,4], index: 3, kind: input, shape index: {}]   ;;  %s227_s5 = inlined_call_operand.vmem [shape: f32[4,32], index: 5, kind: output, shape index: {}]  }
   0x1   :  { %v28_v0 = vld [vmem:[%s222_s0 + $0x38] sm:$0xff]  ;;  %v27_v1 = vld [vmem:[%s222_s0 + $0x30] sm:$0xff]  ;;  %149 = vset.pattern.permute.xlu0 %v152_v2  ;;  %v26_v3 = vld [vmem:[%s222_s0 + $0x28] sm:$0xff]  ;;  %vm138_vm7 = vcmask 257024  }
   0x2   :  { %47 = vmatpush.msra.mxu0 %v28_v0  ;;  %v29_v4 = vld [vmem:[%s223_s2] sm:$0xf]  ;;  %v24_v6 = vld [vmem:[%s222_s0 + $0x18] sm:$0xff]  ;;  %v23_v7 = vld [vmem:[%s222_s0 + $0x10] sm:$0xff] }
   0x3   :  { %v25_v5 = vld [vmem:[%s222_s0 + $0x20] sm:$0xff]  ;;  %32 = vperm.xlu0 %149, %v29_v4   ;;  %v22_v9 = vld [vmem:[%s222_s0 + $0x8] sm:$0xff] }
   0x4   :  { %48 = vmatpush.msra.mxu0 %v27_v1  ;;  %v104_v8 = vld [vmem:[%s224_s4] sm:$0xf] }
   0x5   :  { %v21_v10 = vld [vmem:[%s222_s0] sm:$0xff] }
   0x6   :  { %49 = vmatpush.msra.mxu0 %v26_v3  ;;  %v20_v11 = vld [vmem:[%s225_s1] sm:$0xf] }
   0x7   :  { %v103_v54 = vld [vmem:[%s226_s3] sm:$0xf] }
   0x8   :  { %50 = vmatpush.msra.mxu0 %v25_v5 }
   0xa   :  { %51 = vmatpush.msra.mxu0 %v24_v6 }
   0xb   :  { %107 = vperm.xlu0 %149, %v104_v8  }
   0xc   :  { %52 = vmatpush.msra.mxu0 %v23_v7 }
   0xe   :  { %53 = vmatpush.msra.mxu0 %v22_v9 }
  0x10   :  { %54 = vmatpush.msra.mxu0 %v21_v10 }
  0x11   :  { %144 = vmatmul.msk.f32.vlgmr.msra.gmra.mxu0 %vm35_vm0, %v20_v11 }
  0x75   :  { %v33_v12 = vpop.permute.xlu0 %32 }
  0x7d   :  { %v108_v55 = vpop.permute.xlu0 %107 }
  0x8e   :  { %v56_v13 = vpop.f32.mrf.mxu0 }
  0x8f   :  { %v57_v14 = vadd.f32 %v56_v13, %v33_v12 }
  0x91   :  { %v60_v15 = vmul.f32 0.70710677, %v57_v14  ;;  %v59_v51 = vmul.f32 0.5, %v57_v14 }
  0x93   :  { %v61_v16 = vmul.f32 %v60_v15, %v60_v15 }
  0x95   :  { %v62_v17 = vmin.f32 %v61_v16, 16.0 }
  0x97   :  { %v63_v18 = vmul.f32 2.1237322e-06, %v62_v17  ;;  %v74_v19 = vmul.f32 3.8918573e-05, %v62_v17 }
  0x99   :  { %v64_v20 = vadd.f32 0.00028619796, %v63_v18  ;;  %v75_v21 = vadd.f32 0.001143296, %v74_v19 }
  0x9b   :  { %v65_v22 = vmul.f32 %v64_v20, %v62_v17  ;;  %v76_v23 = vmul.f32 %v75_v21, %v62_v17 }
  0x9d   :  { %v77_v24 = vadd.f32 0.014752088, %v76_v23  ;;  %v66_v25 = vadd.f32 0.0036580483, %v65_v22 }
  0x9f   :  { %v78_v26 = vmul.f32 %v77_v24, %v62_v17  ;;  %v67_v28 = vmul.f32 %v66_v25, %v62_v17 }
  0xa1   :  { %v79_v27 = vadd.f32 0.112945676, %v78_v26  ;;  %v68_v31 = vadd.f32 0.05243302, %v67_v28 }
  0xa3   :  { %v80_v29 = vmul.f32 %v79_v27, %v62_v17  ;;  %v69_v34 = vmul.f32 %v68_v31, %v62_v17 }
  0xa5   :  { %v81_v30 = vadd.f32 0.4994258, %v80_v29  ;;  %v70_v35 = vadd.f32 0.18741608, %v69_v34 }
  0xa7   :  { %v82_v32 = vmul.f32 %v81_v30, %v62_v17  ;;  %v71_v37 = vmul.f32 %v70_v35, %v62_v17 }
  0xa9   :  { %v83_v33 = vadd.f32 1.0, %v82_v32  ;;  %v72_v41 = vadd.f32 1.1283791, %v71_v37 }
  0xab   :  { %150 = vrcp.f32 %v83_v33  ;;  %v95_v40 = vand.u32 2147483648, %v83_v33  ;;  %v93_v43 = vand.u32 2147483647, %v83_v33  ;;  %vm89_vm2 = vweird.f32 %v83_v33 }
  0xac   :  { %v73_v46 = vmul.f32 %v72_v41, %v60_v15 }
  0xad   :  { %v96_v45 = vor.u32 1.1754944e-38, %v95_v40  ;;  %vm94_vm4 = vcmp.eq.f32.partialorder %v93_v43, 8.507059e+37 }
  0xb1   :  { %v151_v36 = vpop.eup %150 }
  0xb2   :  { %v85_v38 = vmul.f32 %v151_v36, %v83_v33  ;;  %vm90_vm1 = vweird.f32 %v151_v36 }
  0xb3   :  { %vm91_vm3 = vmor %vm89_vm2, %vm90_vm1 }
  0xb4   :  { %v86_v39 = vsub.f32 1.0, %v85_v38 }
  0xb6   :  { %v87_v42 = vmul.f32 %v151_v36, %v86_v39 }
  0xb8   :  { %v88_v44 = vadd.f32 %v151_v36, %v87_v42 }
  0xba   :  { %v92_v47 = vsel %vm91_vm3, %v151_v36, %v88_v44 }
  0xbb   :  { %v97_v48 = vsel %vm94_vm4, %v96_v45, %v92_v47 }
  0xbc   :  { %v98_v49 = vmul.f32 %v97_v48, %v73_v46 }
  0xbe   :  { %v145_v50 = vclamps-f32 %v98_v49, 1.0 }
  0xc0   :  { %v101_v52 = vadd.f32 1.0, %v145_v50 }
  0xc2   :  { %v102_v53 = vmul.f32 %v101_v52, %v59_v51 }
  0xc4   :  { %146 = vmatpush.msk.msra.mxu1 %vm114_vm5, %v102_v53 }
  0xc5   :  { %147 = vmatmul.msk.f32.vlgmr.msra.gmra.mxu1 %vm110_vm6, %v103_v54 }
 0x142   :  { %v135_v56 = vpop.f32.mrf.mxu1 }
 0x143   :  { %v136_v57 = vadd.f32 %v135_v56, %v108_v55 }
 0x145   :  { %139 = vst.msk [vmem:[%s227_s5] sm:$0xf] %vm138_vm7, %v136_v57 }

</bundles_post_ra>
